<compile_context>
chip_gen: v5e
topology: v5e:2x2
jax: 0.10.0
libtpu: 0.0.40
codegen_flags: <defaults>
</compile_context>

<pallas_src>
import functools
import math

import jax
import jax.numpy as jnp
import numpy as np
from jax.experimental import pallas as pl
from jax.experimental.pallas import tpu as pltpu

DPAD = 128  # lane-padded feature width (d_model=100 and mem_dim=50 both -> 128)


# ----------------------------------------------------------------------------
# Fused Pallas kernel: attention adjacency -> 2 DualGCN layers -> pool+classify
# ----------------------------------------------------------------------------
def _softmax_last(s):
    m = jnp.max(s, axis=-1, keepdims=True)
    e = jnp.exp(s - m)
    return e * pl.reciprocal(jnp.sum(e, axis=-1, keepdims=True), approx=True)


def _fused_dualgcn_kernel(x_ref, km_ref, rowasp_ref, adjdep_ref, eye_ref, colv_ref,
                          wqk_ref, bqk_ref, wgcn0_ref, bgcn0_ref,
                          wgcn1_ref, bgcn1_ref, waff_ref, wcls_ref, bcls_ref,
                          logits_ref, pen_ref, *, d_model):
    f32, bf16 = jnp.float32, jnp.bfloat16

    x = x_ref[...]                                   # (bt, L, 128) bf16
    bt, L, Dp = x.shape
    eye = eye_ref[...]                               # (L, L) f32 constant identity
    km = km_ref[...]                                 # (bt, 1, L) f32 key mask
    rowasp = rowasp_ref[...]                         # (bt, L, 2) f32
    rm = rowasp[..., 0:1]                            # (bt, L, 1) row mask
    am = rowasp[..., 1:2]                            # (bt, L, 1) aspect mask
    adj_dep_bf = adjdep_ref[...]                     # (bt, L, L) bf16
    adj_dep = adj_dep_bf.astype(f32)

    # --- MultiHeadAttention (h=1): fused, 128-lane-aligned Q|K projection -----
    x2 = x.reshape(bt * L, Dp)
    qk = jnp.dot(x2, wqk_ref[...], preferred_element_type=f32) + bqk_ref[...]
    q = qk[:, :Dp].reshape(bt, L, Dp).astype(bf16)
    k = qk[:, Dp:].reshape(bt, L, Dp).astype(bf16)
    scores = jax.lax.dot_general(q, k, (((2,), (2,)), ((0,), (0,))),
                                 preferred_element_type=f32) * (1.0 / math.sqrt(d_model))
    scores = jnp.where(km == 0.0, -1e9, scores)
    attn = _softmax_last(scores)

    # adj_ag[j] -= diag(diag(adj_ag[j])); adj_ag[j] += I; then row-mask (ref order)
    attn = attn * (1.0 - eye) + eye
    adj_ag = rm * attn                               # (bt, L, L) f32
    adj_ag_bf = adj_ag.astype(bf16)

    # --- penalty partial sums (only two scalars leave the kernel) -------------
    ortho = jax.lax.dot_general(adj_ag_bf, adj_ag_bf, (((2,), (2,)), ((0,), (0,))),
                                preferred_element_type=f32)          # adj_ag @ adj_ag^T
    ortho = ortho * (1.0 - eye) + eye
    sq_ortho = jnp.sum((ortho - eye) ** 2)
    sq_diff = jnp.sum((adj_ag - adj_dep) ** 2)

    # --- normalizers -----------------------------------------------------------
    inv_denom_dep = pl.reciprocal(jnp.sum(adj_dep, axis=-1, keepdims=True) + 1.0,
                                  approx=True)                        # (bt, L, 1)
    inv_denom_ag = pl.reciprocal(jnp.sum(adj_ag, axis=-1, keepdims=True) + 1.0,
                                 approx=True)                         # (bt, L, 1)

    # additive mask hiding L-padding columns from the per-layer softmaxes
    pad_bias = ((colv_ref[...] - 1.0) * 1e9)[None, :, :]              # (1, 1, L)

    waff = waff_ref[...]                                              # blockdiag(aff1, aff2)

    def gcn_layer(out_dep_bf, out_ag_bf, w_ref, b_ref):
        Ax_dep = jax.lax.dot_general(adj_dep_bf, out_dep_bf, (((2,), (1,)), ((0,), (0,))),
                                     preferred_element_type=f32)      # (bt, L, 128)
        Ax_ag = jax.lax.dot_general(adj_ag_bf, out_ag_bf, (((2,), (1,)), ((0,), (0,))),
                                    preferred_element_type=f32)
        # fused dep|ag projection against a block-diagonal weight (one MXU push)
        ax_cat = jnp.concatenate([Ax_dep, Ax_ag], axis=-1).reshape(bt * L, 2 * Dp)
        axw = (jnp.dot(ax_cat.astype(bf16), w_ref[...], preferred_element_type=f32)
               + b_ref[...]).reshape(bt, L, 2 * Dp)
        g_dep = jnp.maximum(axw[..., :Dp] * inv_denom_dep, 0.0)       # f32
        g_ag = jnp.maximum(axw[..., Dp:] * inv_denom_ag, 0.0)
        g_dep_bf = g_dep.astype(bf16)
        g_ag_bf = g_ag.astype(bf16)
        # fused affine1|affine2 (block-diagonal)
        g_cat = jnp.concatenate([g_dep, g_ag], axis=-1).reshape(bt * L, 2 * Dp)
        t = jnp.dot(g_cat.astype(bf16), waff,
                    preferred_element_type=f32).reshape(bt, L, 2 * Dp)
        t1 = t[..., :Dp].astype(bf16)
        t2 = t[..., Dp:].astype(bf16)
        s1 = jax.lax.dot_general(t1, g_ag_bf, (((2,), (2,)), ((0,), (0,))),
                                 preferred_element_type=f32) + pad_bias
        s2 = jax.lax.dot_general(t2, g_dep_bf, (((2,), (2,)), ((0,), (0,))),
                                 preferred_element_type=f32) + pad_bias
        A1 = _softmax_last(s1).astype(bf16)
        A2 = _softmax_last(s2).astype(bf16)
        new_dep = jax.lax.dot_general(A1, g_ag_bf, (((2,), (1,)), ((0,), (0,))),
                                      preferred_element_type=f32)
        new_ag = jax.lax.dot_general(A2, g_dep_bf, (((2,), (1,)), ((0,), (0,))),
                                     preferred_element_type=f32)
        return new_dep, new_ag

    out_dep, out_ag = gcn_layer(x, x, wgcn0_ref, bgcn0_ref)
    out_dep, out_ag = gcn_layer(out_dep.astype(bf16), out_ag.astype(bf16),
                                wgcn1_ref, bgcn1_ref)
    h1, h2 = out_ag, out_dep                                          # (bt, L, 128) f32

    # --- aspect-masked mean pooling + classifier (lane-dense logits) ----------
    cnt = jnp.sum(am, axis=1)                                         # (bt, 1)
    # TODO(synk): reference divides by mask.sum(1).unsqueeze(-1), a shape-invalid
    # broadcast for generic batch sizes; we use the intended per-sample aspect
    # count (original DualGCN semantics). cnt==0 yields inf, like the reference.
    inv_cnt = 1.0 / cnt                                               # exact (feeds classifier)
    o1 = jnp.sum(h1 * am, axis=1) * inv_cnt                           # (bt, 128)
    o2 = jnp.sum(h2 * am, axis=1) * inv_cnt
    final = jnp.concatenate([o1, o2], axis=-1).astype(bf16)           # (bt, 256)
    logits_ref[0] = (jnp.dot(final, wcls_ref[...], preferred_element_type=f32)
                     + bcls_ref[...])

    # two penalty partial sums -> one lane-dense (1, 128) row per tile
    lane = jax.lax.broadcasted_iota(jnp.int32, (1, 128), 1)
    pen_ref[0] = jnp.where(lane == 0, sq_ortho,
                           jnp.where(lane == 1, sq_diff, 0.0))


# ----------------------------------------------------------------------------
# host-side weight packing, tile sizing and pallas_call wrapper
# ----------------------------------------------------------------------------
def _prep_weights(params):
    f32, bf16 = jnp.float32, jnp.bfloat16

    def pad_mat(w):                                  # (r, c) -> (DPAD, DPAD)
        return jnp.zeros((DPAD, DPAD), f32).at[:w.shape[0], :w.shape[1]].set(w)

    def bdiag(w1, w2):                               # lane-tile-aligned block diagonal
        out = jnp.zeros((2 * DPAD, 2 * DPAD), f32)
        out = out.at[:w1.shape[0], :w1.shape[1]].set(w1)
        out = out.at[DPAD:DPAD + w2.shape[0], DPAD:DPAD + w2.shape[1]].set(w2)
        return out

    def bcat(b1, b2):
        out = jnp.zeros((1, 2 * DPAD), f32)
        out = out.at[0, :b1.shape[0]].set(b1)
        out = out.at[0, DPAD:DPAD + b2.shape[0]].set(b2)
        return out

    H = params['W_dep'][0].shape[1]
    ncls = params['cls_w'].shape[1]
    wcls = jnp.zeros((2 * DPAD, 128), f32)
    wcls = wcls.at[:H, :ncls].set(params['cls_w'][:H])
    wcls = wcls.at[DPAD:DPAD + H, :ncls].set(params['cls_w'][H:])

    return {
        'wqk': jnp.concatenate([pad_mat(params['attn_wq']),
                                pad_mat(params['attn_wk'])], axis=1).astype(bf16),
        'bqk': bcat(params['attn_bq'], params['attn_bk']),
        'wgcn0': bdiag(params['W_dep'][0], params['W_ag'][0]).astype(bf16),
        'bgcn0': bcat(params['b_dep'][0], params['b_ag'][0]),
        'wgcn1': bdiag(params['W_dep'][1], params['W_ag'][1]).astype(bf16),
        'bgcn1': bcat(params['b_dep'][1], params['b_ag'][1]),
        'waff': bdiag(params['affine1'], params['affine2']).astype(bf16),
        'wcls': wcls.astype(bf16),
        'bcls': jnp.zeros((1, 128), f32).at[0, :ncls].set(params['cls_b']),
    }


def _vmem_capacity_bytes():
    try:
        return int(pltpu.get_tpu_info().vmem_capacity_bytes)
    except Exception:
        return 64 * 1024 * 1024          # conservative fallback (v7x per-core VMEM)


def _pick_batch_tile(B, Lp, budget_bytes):
    # per-sample live-set estimate: double-buffered bf16 inputs plus ~10 (L,L)
    # and ~14 (L,256) f32 temporaries alive at once.
    per = (2 * (Lp * DPAD * 2 + Lp * Lp * 2 + 3 * Lp * 4)
           + 10 * Lp * Lp * 4
           + 14 * Lp * 2 * DPAD * 4)
    bt = B if B < 2 else B // 2          # >=2 grid steps: megacore + DMA/compute overlap
    while bt > 1 and (B % bt != 0 or bt * per > budget_bytes):
        bt -= 1
    if bt >= 16 and B % ((bt // 8) * 8) == 0:
        bt = (bt // 8) * 8               # sublane-aligned logits stores
    return max(bt, 1)


def fused_dualgcn_pallas(gcn_inputs, src_mask, aspect_mask, adj_dep, params):
    B, L0, D = gcn_inputs.shape
    ncls = params['cls_w'].shape[1]

    Lp = ((L0 + 7) // 8) * 8
    pad_l = Lp - L0
    x = jnp.pad(gcn_inputs, ((0, 0), (0, pad_l), (0, DPAD - D))).astype(jnp.bfloat16)
    adj = jnp.pad(adj_dep, ((0, 0), (0, pad_l), (0, pad_l))).astype(jnp.bfloat16)
    src = jnp.pad(src_mask.astype(jnp.float32), ((0, 0), (0, pad_l)))
    asp = jnp.pad(aspect_mask.astype(jnp.float32), ((0, 0), (0, pad_l)))
    km = src[:, None, :]                              # (B, 1, Lp) lane-dense key mask
    rowasp = jnp.stack([src, asp], axis=-1)           # (B, Lp, 2) row + aspect masks
    colv = (jnp.arange(Lp) < L0).astype(jnp.float32)[None, :]   # (1, Lp)
    eye = jnp.eye(Lp, dtype=jnp.float32)

    w = _prep_weights(params)

    cap = _vmem_capacity_bytes()
    bt = _pick_batch_tile(B, Lp, max(16 << 20, cap // 2 - (4 << 20)))
    nt = B // bt

    tile3 = lambda shp: pl.BlockSpec(shp, lambda i: (i, 0, 0))
    full2 = lambda shp: pl.BlockSpec(shp, lambda i: (0, 0))

    kernel = functools.partial(_fused_dualgcn_kernel, d_model=D)

    logits_pad, pen = pl.pallas_call(
        kernel,
        out_shape=(jax.ShapeDtypeStruct((nt, bt, 128), jnp.float32),
                   jax.ShapeDtypeStruct((nt, 1, 128), jnp.float32)),
        grid=(nt,),
        in_specs=[
            tile3((bt, Lp, DPAD)),                    # gcn_inputs (bf16)
            tile3((bt, 1, Lp)),                       # key mask
            tile3((bt, Lp, 2)),                       # row + aspect masks
            tile3((bt, Lp, Lp)),                      # adj_dep (bf16)
            full2((Lp, Lp)),                          # identity
            full2((1, Lp)),                           # column validity (L padding)
            full2((DPAD, 2 * DPAD)), full2((1, 2 * DPAD)),        # wqk, bqk
            full2((2 * DPAD, 2 * DPAD)), full2((1, 2 * DPAD)),    # wgcn0, bgcn0
            full2((2 * DPAD, 2 * DPAD)), full2((1, 2 * DPAD)),    # wgcn1, bgcn1
            full2((2 * DPAD, 2 * DPAD)),                          # blockdiag(aff1, aff2)
            full2((2 * DPAD, 128)), full2((1, 128)),              # wcls, bcls
        ],
        out_specs=(pl.BlockSpec((1, bt, 128), lambda i: (i, 0, 0)),
                   pl.BlockSpec((1, 1, 128), lambda i: (i, 0, 0))),
        compiler_params=pltpu.CompilerParams(
            dimension_semantics=("parallel",),
            vmem_limit_bytes=min(cap * 3 // 4, 96 * 1024 * 1024)),
    )(x, km, rowasp, adj, eye, colv,
      w['wqk'], w['bqk'], w['wgcn0'], w['bgcn0'],
      w['wgcn1'], w['bgcn1'], w['waff'], w['wcls'], w['bcls'])

    logits = logits_pad.reshape(B, 128)[:, :ncls]
    sq_ortho = jnp.sum(pen[:, 0, 0])
    sq_diff = jnp.sum(pen[:, 0, 1])
    return logits, sq_ortho, sq_diff


# ----------------------------------------------------------------------------
# Plain-JAX glue: embeddings + packed-sequence BiLSTM encoder
# ----------------------------------------------------------------------------
def bilstm_encode(embs, lengths, p):
    # nn.LSTM(360, 50, 1, batch_first=True, bidirectional=True) with
    # pack_padded_sequence / pad_packed_sequence semantics (zeros past len,
    # backward direction starts at position len-1 from zero initial state).
    # TODO(synk): sequential recurrence kept in plain JAX (lax.scan), not Pallas;
    # the input projection is hoisted out of the scan as one big matmul.
    B, Lm, Din = embs.shape
    valid = (jnp.arange(Lm)[None, :] < lengths[:, None]).astype(jnp.float32)

    def run(wih, whh, bih, bhh, xs, mask, reverse):
        if reverse:
            xs = xs[:, ::-1]
            mask = mask[:, ::-1]
        xproj = (xs.reshape(B * Lm, Din) @ wih.T + bih).reshape(B, Lm, -1)
        xproj_t = jnp.transpose(xproj, (1, 0, 2))          # (Lm, B, 200)
        mask_t = mask.T[:, :, None]                        # (Lm, B, 1)
        h0 = jnp.zeros((B, 50), jnp.float32)
        c0 = jnp.zeros((B, 50), jnp.float32)

        def step(carry, inp):
            h, c = carry
            gx, m_t = inp
            gates = gx + h @ whh.T + bhh                   # gate order i, f, g, o
            i = jax.nn.sigmoid(gates[:, 0:50])
            f = jax.nn.sigmoid(gates[:, 50:100])
            g = jnp.tanh(gates[:, 100:150])
            o = jax.nn.sigmoid(gates[:, 150:200])
            c_new = f * c + i * g
            h_new = o * jnp.tanh(c_new)
            h_out = jnp.where(m_t > 0, h_new, h)
            c_out = jnp.where(m_t > 0, c_new, c)
            y = jnp.where(m_t > 0, h_new, 0.0)
            return (h_out, c_out), y

        _, ys = jax.lax.scan(step, (h0, c0), (xproj_t, mask_t))
        ys = jnp.transpose(ys, (1, 0, 2))                  # (B, Lm, 50)
        if reverse:
            ys = ys[:, ::-1]
        return ys

    fwd = run(p['lstm_wih_f'], p['lstm_whh_f'], p['lstm_bih_f'], p['lstm_bhh_f'],
              embs, valid, False)
    bwd = run(p['lstm_wih_b'], p['lstm_whh_b'], p['lstm_bih_b'], p['lstm_bhh_b'],
              embs, valid, True)
    return jnp.concatenate([fwd, bwd], axis=-1)            # (B, Lm, 100)


def dualgcn_forward(params, tok, pos, post, aspect_mask, lengths, adj):
    B, _ = tok.shape
    maxlen = int(np.max(np.asarray(lengths)))
    tok = tok[:, :maxlen]
    pos = pos[:, :maxlen]
    post = post[:, :maxlen]
    aspect_mask = aspect_mask[:, :maxlen].astype(jnp.float32)
    adj_dep = adj[:, :maxlen, :maxlen].astype(jnp.float32)

    # embeddings (300 + 30 + 30 = 360)
    word_embs = jnp.take(params['emb'], tok, axis=0)
    pos_embs = jnp.take(params['pos_emb'], pos, axis=0)
    post_embs = jnp.take(params['post_emb'], post, axis=0)
    embs = jnp.concatenate([word_embs, pos_embs, post_embs], axis=2)

    # BiLSTM encoder (all dropouts are identity in eval mode)
    gcn_inputs = bilstm_encode(embs, lengths, params)      # (B, maxlen, 100)

    src_mask = (tok != 0).astype(jnp.float32)              # (B, maxlen)

    # Fused kernel: attention adjacency -> 2 DualGCN layers -> pool + classify
    logits, sq_ortho, sq_diff = fused_dualgcn_pallas(
        gcn_inputs, src_mask, aspect_mask, adj_dep, params)

    penal = (0.25 * (jnp.sqrt(sq_ortho) / float(B))
             + 0.25 * (float(B) / jnp.sqrt(sq_diff)))
    return logits, penal


# ----------------------------------------------------------------------------
# deterministic parameter init (synthetic; shapes follow the module's __init__)
# ----------------------------------------------------------------------------
def init_params(key, vocab):
    ks = jax.random.split(key, 32)
    rn = lambda k, shape, s=0.1: (s * jax.random.normal(k, shape)).astype(jnp.float32)
    p = {}
    p['emb'] = rn(ks[0], (vocab, 300), 1.0)                    # frozen word embeddings
    p['pos_emb'] = rn(ks[1], (49, 30)).at[0].set(0.0)          # padding_idx=0
    p['post_emb'] = rn(ks[2], (146, 30)).at[0].set(0.0)        # padding_idx=0
    # BiLSTM(360 -> 50, bidirectional): gate order i, f, g, o
    p['lstm_wih_f'] = rn(ks[3], (200, 360))
    p['lstm_whh_f'] = rn(ks[4], (200, 50))
    p['lstm_bih_f'] = rn(ks[5], (200,))
    p['lstm_bhh_f'] = rn(ks[6], (200,))
    p['lstm_wih_b'] = rn(ks[7], (200, 360))
    p['lstm_whh_b'] = rn(ks[8], (200, 50))
    p['lstm_bih_b'] = rn(ks[9], (200,))
    p['lstm_bhh_b'] = rn(ks[10], (200,))
    # MultiHeadAttention(h=1, d_model=100): two Linear(100,100), stored (in,out)
    p['attn_wq'] = rn(ks[11], (100, 100))
    p['attn_bq'] = rn(ks[12], (100,))
    p['attn_wk'] = rn(ks[13], (100, 100))
    p['attn_bk'] = rn(ks[14], (100,))
    # GCN linear layers (layer0: 100->50, layer1: 50->50), stored (in,out)
    p['W_dep'] = [rn(ks[15], (100, 50)), rn(ks[16], (50, 50))]
    p['b_dep'] = [rn(ks[17], (50,)), rn(ks[18], (50,))]
    p['W_ag'] = [rn(ks[19], (100, 50)), rn(ks[20], (50, 50))]
    p['b_ag'] = [rn(ks[21], (50,)), rn(ks[22], (50,))]
    p['affine1'] = rn(ks[23], (50, 50))
    p['affine2'] = rn(ks[24], (50, 50))
    # classifier Linear(100, 3), stored (in,out)
    p['cls_w'] = rn(ks[25], (100, 3))
    p['cls_b'] = rn(ks[26], (3,))
    return p


if __name__ == "__main__":
    key = jax.random.PRNGKey(0)
    B, L, vocab = 2, 8, 20
    params = init_params(key, vocab)

    k_tok, k_pos, k_post, k_adj = jax.random.split(jax.random.PRNGKey(0), 4)
    lengths = jnp.array([8, 6], dtype=jnp.int32)
    pos_idx = jnp.arange(L)[None, :]
    valid = (pos_idx < lengths[:, None]).astype(jnp.int32)     # (B, L)

    tok = jax.random.randint(k_tok, (B, L), 1, vocab) * valid
    pos = jax.random.randint(k_pos, (B, L), 1, 49) * valid
    post = jax.random.randint(k_post, (B, L), 1, 146) * valid
    # aspect mask: positions 2..3 are the aspect term in both examples
    aspect_mask = ((pos_idx >= 2) & (pos_idx < 4)).astype(jnp.float32)
    aspect_mask = jnp.broadcast_to(aspect_mask, (B, L))
    # dependency adjacency (0/1), zeroed outside valid region
    adj = jax.random.bernoulli(k_adj, 0.4, (B, L, L)).astype(jnp.float32)
    adj = adj * valid[:, :, None].astype(jnp.float32) * valid[:, None, :].astype(jnp.float32)

    logits, penal = dualgcn_forward(params, tok, pos, post, aspect_mask, lengths, adj)
    jax.block_until_ready((logits, penal))
    assert logits.shape == (B, 3)
    assert penal.shape == ()
    print("KERNEL_OK")
</pallas_src>

<mosaic_0001>
module attributes {stable_mosaic.version = 11 : i64} {
  func.func @_fused_dualgcn_kernel(%arg0: i32, %arg1: memref<1x8x128xbf16, #tpu.memory_space<vmem>>, %arg2: memref<1x1x8xf32, #tpu.memory_space<vmem>>, %arg3: memref<1x8x2xf32, #tpu.memory_space<vmem>>, %arg4: memref<1x8x8xbf16, #tpu.memory_space<vmem>>, %arg5: memref<8x8xf32, #tpu.memory_space<vmem>>, %arg6: memref<1x8xf32, #tpu.memory_space<vmem>>, %arg7: memref<128x256xbf16, #tpu.memory_space<vmem>>, %arg8: memref<1x256xf32, #tpu.memory_space<vmem>>, %arg9: memref<256x256xbf16, #tpu.memory_space<vmem>>, %arg10: memref<1x256xf32, #tpu.memory_space<vmem>>, %arg11: memref<256x256xbf16, #tpu.memory_space<vmem>>, %arg12: memref<1x256xf32, #tpu.memory_space<vmem>>, %arg13: memref<256x256xbf16, #tpu.memory_space<vmem>>, %arg14: memref<256x128xbf16, #tpu.memory_space<vmem>>, %arg15: memref<1x128xf32, #tpu.memory_space<vmem>>, %arg16: memref<1x1x128xf32, #tpu.memory_space<vmem>>, %arg17: memref<1x1x128xf32, #tpu.memory_space<vmem>>) attributes {dimension_semantics = [#tpu.dimension_semantics<parallel>], iteration_bounds = array<i64: 2>, scalar_prefetch = 0 : i64, scratch_operands = 0 : i64, tpu.core_type = #tpu.core_type<tc>, window_params = [{transform_indices = @transform_0, window_bounds = array<i64: 1, 8, 128>}, {transform_indices = @transform_1, window_bounds = array<i64: 1, 1, 8>}, {transform_indices = @transform_2, window_bounds = array<i64: 1, 8, 2>}, {transform_indices = @transform_3, window_bounds = array<i64: 1, 8, 8>}, {pipeline_mode = #tpu.pipeline_mode<synchronous>, transform_indices = @transform_4, window_bounds = array<i64: 8, 8>}, {pipeline_mode = #tpu.pipeline_mode<synchronous>, transform_indices = @transform_5, window_bounds = array<i64: 1, 8>}, {pipeline_mode = #tpu.pipeline_mode<synchronous>, transform_indices = @transform_6, window_bounds = array<i64: 128, 256>}, {pipeline_mode = #tpu.pipeline_mode<synchronous>, transform_indices = @transform_7, window_bounds = array<i64: 1, 256>}, {pipeline_mode = #tpu.pipeline_mode<synchronous>, transform_indices = @transform_8, window_bounds = array<i64: 256, 256>}, {pipeline_mode = #tpu.pipeline_mode<synchronous>, transform_indices = @transform_9, window_bounds = array<i64: 1, 256>}, {pipeline_mode = #tpu.pipeline_mode<synchronous>, transform_indices = @transform_10, window_bounds = array<i64: 256, 256>}, {pipeline_mode = #tpu.pipeline_mode<synchronous>, transform_indices = @transform_11, window_bounds = array<i64: 1, 256>}, {pipeline_mode = #tpu.pipeline_mode<synchronous>, transform_indices = @transform_12, window_bounds = array<i64: 256, 256>}, {pipeline_mode = #tpu.pipeline_mode<synchronous>, transform_indices = @transform_13, window_bounds = array<i64: 256, 128>}, {pipeline_mode = #tpu.pipeline_mode<synchronous>, transform_indices = @transform_14, window_bounds = array<i64: 1, 128>}, {transform_indices = @transform_15, window_bounds = array<i64: 1, 1, 128>}, {transform_indices = @transform_16, window_bounds = array<i64: 1, 1, 128>}]} {
    %c0 = arith.constant 0 : index
    %c0_0 = arith.constant 0 : index
    %c0_1 = arith.constant 0 : index
    %0 = vector.load %arg1[%c0, %c0_0, %c0_1] : memref<1x8x128xbf16, #tpu.memory_space<vmem>>, vector<1x8x128xbf16>
    %c0_2 = arith.constant 0 : index
    %c0_3 = arith.constant 0 : index
    %1 = vector.load %arg5[%c0_2, %c0_3] : memref<8x8xf32, #tpu.memory_space<vmem>>, vector<8x8xf32>
    %c0_4 = arith.constant 0 : index
    %c0_5 = arith.constant 0 : index
    %c0_6 = arith.constant 0 : index
    %2 = vector.load %arg2[%c0_4, %c0_5, %c0_6] : memref<1x1x8xf32, #tpu.memory_space<vmem>>, vector<1x1x8xf32>
    %c0_7 = arith.constant 0 : index
    %c0_8 = arith.constant 0 : index
    %c0_9 = arith.constant 0 : index
    %3 = vector.load %arg3[%c0_7, %c0_8, %c0_9] : memref<1x8x2xf32, #tpu.memory_space<vmem>>, vector<1x8x2xf32>
    %4 = vector.extract_strided_slice %3 {offsets = [0, 0, 0], sizes = [1, 8, 1], strides = [1, 1, 1]} : vector<1x8x2xf32> to vector<1x8x1xf32>
    %5 = vector.extract_strided_slice %3 {offsets = [0, 0, 1], sizes = [1, 8, 1], strides = [1, 1, 1]} : vector<1x8x2xf32> to vector<1x8x1xf32>
    %c0_10 = arith.constant 0 : index
    %c0_11 = arith.constant 0 : index
    %c0_12 = arith.constant 0 : index
    %6 = vector.load %arg4[%c0_10, %c0_11, %c0_12] : memref<1x8x8xbf16, #tpu.memory_space<vmem>>, vector<1x8x8xbf16>
    %7 = arith.extf %6 : vector<1x8x8xbf16> to vector<1x8x8xf32>
    %8 = vector.shape_cast %0 : vector<1x8x128xbf16> to vector<8x128xbf16>
    %c0_13 = arith.constant 0 : index
    %c0_14 = arith.constant 0 : index
    %9 = vector.load %arg7[%c0_13, %c0_14] : memref<128x256xbf16, #tpu.memory_space<vmem>>, vector<128x256xbf16>
    %cst = arith.constant dense<0.000000e+00> : vector<8x256xf32>
    %10 = tpu.matmul %8, %9, %cst {dimension_numbers = #tpu.dot_dimension_numbers<[1], [0], [0], [1], [0, 0, 1, 1], [], []>} : vector<8x128xbf16>, vector<128x256xbf16>, vector<8x256xf32> -> vector<8x256xf32>
    %c0_15 = arith.constant 0 : index
    %c0_16 = arith.constant 0 : index
    %11 = vector.load %arg8[%c0_15, %c0_16] : memref<1x256xf32, #tpu.memory_space<vmem>>, vector<1x256xf32>
    %12 = vector.broadcast %11 : vector<1x256xf32> to vector<8x256xf32>
    %13 = arith.addf %10, %12 : vector<8x256xf32>
    %14 = vector.extract_strided_slice %13 {offsets = [0, 0], sizes = [8, 128], strides = [1, 1]} : vector<8x256xf32> to vector<8x128xf32>
    %15 = vector.shape_cast %14 : vector<8x128xf32> to vector<1x8x128xf32>
    %16 = arith.truncf %15 : vector<1x8x128xf32> to vector<1x8x128xbf16>
    %17 = vector.extract_strided_slice %13 {offsets = [0, 128], sizes = [8, 128], strides = [1, 1]} : vector<8x256xf32> to vector<8x128xf32>
    %18 = vector.shape_cast %17 : vector<8x128xf32> to vector<1x8x128xf32>
    %19 = arith.truncf %18 : vector<1x8x128xf32> to vector<1x8x128xbf16>
    %cst_17 = arith.constant dense<0.000000e+00> : vector<1x8x8xf32>
    %20 = tpu.matmul %16, %19, %cst_17 {dimension_numbers = #tpu.dot_dimension_numbers<[2], [2], [1], [1], [0, 0, 0, 1, 1, 1], [0], [0]>} : vector<1x8x128xbf16>, vector<1x8x128xbf16>, vector<1x8x8xf32> -> vector<1x8x8xf32>
    %cst_18 = arith.constant 1.000000e-01 : f32
    %21 = vector.broadcast %cst_18 : f32 to vector<1x8x8xf32>
    %22 = arith.mulf %20, %21 : vector<1x8x8xf32>
    %cst_19 = arith.constant 0.000000e+00 : f32
    %23 = vector.broadcast %cst_19 : f32 to vector<1x1x8xf32>
    %24 = arith.cmpf oeq, %2, %23 : vector<1x1x8xf32>
    %cst_20 = arith.constant -1.000000e+09 : f32
    %25 = vector.shape_cast %24 : vector<1x1x8xi1> to vector<1x1x8xi1>
    %26 = vector.broadcast %25 : vector<1x1x8xi1> to vector<1x8x8xi1>
    %27 = vector.broadcast %cst_20 : f32 to vector<1x8x8xf32>
    %28 = arith.select %26, %27, %22 : vector<1x8x8xi1>, vector<1x8x8xf32>
    %cst_21 = arith.constant dense<0xFF800000> : vector<1x8xf32>
    %29 = vector.multi_reduction <maximumf>, %28, %cst_21 [2] : vector<1x8x8xf32> to vector<1x8xf32>
    %30 = vector.shape_cast %29 : vector<1x8xf32> to vector<1x8x1xf32>
    %31 = vector.broadcast %30 : vector<1x8x1xf32> to vector<1x8x8xf32>
    %32 = arith.subf %28, %31 : vector<1x8x8xf32>
    %33 = math.exp %32 : vector<1x8x8xf32>
    %cst_22 = arith.constant dense<0.000000e+00> : vector<1x8xf32>
    %34 = vector.multi_reduction <add>, %33, %cst_22 [2] : vector<1x8x8xf32> to vector<1x8xf32>
    %35 = vector.shape_cast %34 : vector<1x8xf32> to vector<1x8x1xf32>
    %36 = tpu.reciprocal %35 {approx = true} : vector<1x8x1xf32> -> vector<1x8x1xf32>
    %37 = vector.broadcast %36 : vector<1x8x1xf32> to vector<1x8x8xf32>
    %38 = arith.mulf %33, %37 : vector<1x8x8xf32>
    %cst_23 = arith.constant 1.000000e+00 : f32
    %39 = vector.broadcast %cst_23 : f32 to vector<8x8xf32>
    %40 = arith.subf %39, %1 : vector<8x8xf32>
    %41 = vector.shape_cast %40 : vector<8x8xf32> to vector<1x8x8xf32>
    %42 = arith.mulf %38, %41 : vector<1x8x8xf32>
    %43 = vector.shape_cast %1 : vector<8x8xf32> to vector<1x8x8xf32>
    %44 = arith.addf %42, %43 : vector<1x8x8xf32>
    %45 = vector.broadcast %4 : vector<1x8x1xf32> to vector<1x8x8xf32>
    %46 = arith.mulf %45, %44 : vector<1x8x8xf32>
    %47 = arith.truncf %46 : vector<1x8x8xf32> to vector<1x8x8xbf16>
    %cst_24 = arith.constant dense<0.000000e+00> : vector<1x8x8xf32>
    %48 = tpu.matmul %47, %47, %cst_24 {dimension_numbers = #tpu.dot_dimension_numbers<[2], [2], [1], [1], [0, 0, 0, 1, 1, 1], [0], [0]>} : vector<1x8x8xbf16>, vector<1x8x8xbf16>, vector<1x8x8xf32> -> vector<1x8x8xf32>
    %cst_25 = arith.constant 1.000000e+00 : f32
    %49 = vector.broadcast %cst_25 : f32 to vector<8x8xf32>
    %50 = arith.subf %49, %1 : vector<8x8xf32>
    %51 = vector.shape_cast %50 : vector<8x8xf32> to vector<1x8x8xf32>
    %52 = arith.mulf %48, %51 : vector<1x8x8xf32>
    %53 = vector.shape_cast %1 : vector<8x8xf32> to vector<1x8x8xf32>
    %54 = arith.addf %52, %53 : vector<1x8x8xf32>
    %55 = vector.shape_cast %1 : vector<8x8xf32> to vector<1x8x8xf32>
    %56 = arith.subf %54, %55 : vector<1x8x8xf32>
    %57 = arith.mulf %56, %56 : vector<1x8x8xf32>
    %58 = vector.shape_cast %57 : vector<1x8x8xf32> to vector<1x1x8x8xf32>
    %cst_26 = arith.constant dense<0.000000e+00> : vector<1xf32>
    %59 = vector.multi_reduction <add>, %58, %cst_26 [1, 2, 3] : vector<1x1x8x8xf32> to vector<1xf32>
    %60 = vector.shape_cast %59 : vector<1xf32> to vector<1x1x1x1xf32>
    %61 = vector.extract %60[0, 0, 0, 0] : f32 from vector<1x1x1x1xf32>
    %62 = arith.subf %46, %7 : vector<1x8x8xf32>
    %63 = arith.mulf %62, %62 : vector<1x8x8xf32>
    %64 = vector.shape_cast %63 : vector<1x8x8xf32> to vector<1x1x8x8xf32>
    %cst_27 = arith.constant dense<0.000000e+00> : vector<1xf32>
    %65 = vector.multi_reduction <add>, %64, %cst_27 [1, 2, 3] : vector<1x1x8x8xf32> to vector<1xf32>
    %66 = vector.shape_cast %65 : vector<1xf32> to vector<1x1x1x1xf32>
    %67 = vector.extract %66[0, 0, 0, 0] : f32 from vector<1x1x1x1xf32>
    %cst_28 = arith.constant dense<0.000000e+00> : vector<1x8xf32>
    %68 = vector.multi_reduction <add>, %7, %cst_28 [2] : vector<1x8x8xf32> to vector<1x8xf32>
    %69 = vector.shape_cast %68 : vector<1x8xf32> to vector<1x8x1xf32>
    %cst_29 = arith.constant 1.000000e+00 : f32
    %70 = vector.broadcast %cst_29 : f32 to vector<1x8x1xf32>
    %71 = arith.addf %69, %70 : vector<1x8x1xf32>
    %72 = tpu.reciprocal %71 {approx = true} : vector<1x8x1xf32> -> vector<1x8x1xf32>
    %cst_30 = arith.constant dense<0.000000e+00> : vector<1x8xf32>
    %73 = vector.multi_reduction <add>, %46, %cst_30 [2] : vector<1x8x8xf32> to vector<1x8xf32>
    %74 = vector.shape_cast %73 : vector<1x8xf32> to vector<1x8x1xf32>
    %cst_31 = arith.constant 1.000000e+00 : f32
    %75 = vector.broadcast %cst_31 : f32 to vector<1x8x1xf32>
    %76 = arith.addf %74, %75 : vector<1x8x1xf32>
    %77 = tpu.reciprocal %76 {approx = true} : vector<1x8x1xf32> -> vector<1x8x1xf32>
    %c0_32 = arith.constant 0 : index
    %c0_33 = arith.constant 0 : index
    %78 = vector.load %arg6[%c0_32, %c0_33] : memref<1x8xf32, #tpu.memory_space<vmem>>, vector<1x8xf32>
    %cst_34 = arith.constant 1.000000e+00 : f32
    %79 = vector.broadcast %cst_34 : f32 to vector<1x8xf32>
    %80 = arith.subf %78, %79 : vector<1x8xf32>
    %cst_35 = arith.constant 1.000000e+09 : f32
    %81 = vector.broadcast %cst_35 : f32 to vector<1x8xf32>
    %82 = arith.mulf %80, %81 : vector<1x8xf32>
    %83 = vector.shape_cast %82 : vector<1x8xf32> to vector<1x1x8xf32>
    %c0_36 = arith.constant 0 : index
    %c0_37 = arith.constant 0 : index
    %84 = vector.load %arg13[%c0_36, %c0_37] : memref<256x256xbf16, #tpu.memory_space<vmem>>, vector<256x256xbf16>
    %cst_38 = arith.constant dense<0.000000e+00> : vector<1x8x128xf32>
    %85 = tpu.matmul %6, %0, %cst_38 {dimension_numbers = #tpu.dot_dimension_numbers<[2], [1], [1], [2], [0, 0, 0, 1, 1, 2], [0], [0]>} : vector<1x8x8xbf16>, vector<1x8x128xbf16>, vector<1x8x128xf32> -> vector<1x8x128xf32>
    %cst_39 = arith.constant dense<0.000000e+00> : vector<1x8x128xf32>
    %86 = tpu.matmul %47, %0, %cst_39 {dimension_numbers = #tpu.dot_dimension_numbers<[2], [1], [1], [2], [0, 0, 0, 1, 1, 2], [0], [0]>} : vector<1x8x8xbf16>, vector<1x8x128xbf16>, vector<1x8x128xf32> -> vector<1x8x128xf32>
    %87 = tpu.concatenate %85, %86 in 2 : vector<1x8x128xf32>, vector<1x8x128xf32> -> vector<1x8x256xf32>
    %88 = vector.shape_cast %87 : vector<1x8x256xf32> to vector<8x256xf32>
    %89 = arith.truncf %88 : vector<8x256xf32> to vector<8x256xbf16>
    %c0_40 = arith.constant 0 : index
    %c0_41 = arith.constant 0 : index
    %90 = vector.load %arg9[%c0_40, %c0_41] : memref<256x256xbf16, #tpu.memory_space<vmem>>, vector<256x256xbf16>
    %cst_42 = arith.constant dense<0.000000e+00> : vector<8x256xf32>
    %91 = tpu.matmul %89, %90, %cst_42 {dimension_numbers = #tpu.dot_dimension_numbers<[1], [0], [0], [1], [0, 0, 1, 1], [], []>} : vector<8x256xbf16>, vector<256x256xbf16>, vector<8x256xf32> -> vector<8x256xf32>
    %c0_43 = arith.constant 0 : index
    %c0_44 = arith.constant 0 : index
    %92 = vector.load %arg10[%c0_43, %c0_44] : memref<1x256xf32, #tpu.memory_space<vmem>>, vector<1x256xf32>
    %93 = vector.broadcast %92 : vector<1x256xf32> to vector<8x256xf32>
    %94 = arith.addf %91, %93 : vector<8x256xf32>
    %95 = vector.shape_cast %94 : vector<8x256xf32> to vector<1x8x256xf32>
    %96 = vector.extract_strided_slice %95 {offsets = [0, 0, 0], sizes = [1, 8, 128], strides = [1, 1, 1]} : vector<1x8x256xf32> to vector<1x8x128xf32>
    %97 = vector.broadcast %72 : vector<1x8x1xf32> to vector<1x8x128xf32>
    %98 = arith.mulf %96, %97 : vector<1x8x128xf32>
    %cst_45 = arith.constant 0.000000e+00 : f32
    %99 = vector.broadcast %cst_45 : f32 to vector<1x8x128xf32>
    %100 = arith.maximumf %98, %99 : vector<1x8x128xf32>
    %101 = vector.extract_strided_slice %95 {offsets = [0, 0, 128], sizes = [1, 8, 128], strides = [1, 1, 1]} : vector<1x8x256xf32> to vector<1x8x128xf32>
    %102 = vector.broadcast %77 : vector<1x8x1xf32> to vector<1x8x128xf32>
    %103 = arith.mulf %101, %102 : vector<1x8x128xf32>
    %cst_46 = arith.constant 0.000000e+00 : f32
    %104 = vector.broadcast %cst_46 : f32 to vector<1x8x128xf32>
    %105 = arith.maximumf %103, %104 : vector<1x8x128xf32>
    %106 = arith.truncf %100 : vector<1x8x128xf32> to vector<1x8x128xbf16>
    %107 = arith.truncf %105 : vector<1x8x128xf32> to vector<1x8x128xbf16>
    %108 = tpu.concatenate %100, %105 in 2 : vector<1x8x128xf32>, vector<1x8x128xf32> -> vector<1x8x256xf32>
    %109 = vector.shape_cast %108 : vector<1x8x256xf32> to vector<8x256xf32>
    %110 = arith.truncf %109 : vector<8x256xf32> to vector<8x256xbf16>
    %cst_47 = arith.constant dense<0.000000e+00> : vector<8x256xf32>
    %111 = tpu.matmul %110, %84, %cst_47 {dimension_numbers = #tpu.dot_dimension_numbers<[1], [0], [0], [1], [0, 0, 1, 1], [], []>} : vector<8x256xbf16>, vector<256x256xbf16>, vector<8x256xf32> -> vector<8x256xf32>
    %112 = vector.shape_cast %111 : vector<8x256xf32> to vector<1x8x256xf32>
    %113 = vector.extract_strided_slice %112 {offsets = [0, 0, 0], sizes = [1, 8, 128], strides = [1, 1, 1]} : vector<1x8x256xf32> to vector<1x8x128xf32>
    %114 = arith.truncf %113 : vector<1x8x128xf32> to vector<1x8x128xbf16>
    %115 = vector.extract_strided_slice %112 {offsets = [0, 0, 128], sizes = [1, 8, 128], strides = [1, 1, 1]} : vector<1x8x256xf32> to vector<1x8x128xf32>
    %116 = arith.truncf %115 : vector<1x8x128xf32> to vector<1x8x128xbf16>
    %cst_48 = arith.constant dense<0.000000e+00> : vector<1x8x8xf32>
    %117 = tpu.matmul %114, %107, %cst_48 {dimension_numbers = #tpu.dot_dimension_numbers<[2], [2], [1], [1], [0, 0, 0, 1, 1, 1], [0], [0]>} : vector<1x8x128xbf16>, vector<1x8x128xbf16>, vector<1x8x8xf32> -> vector<1x8x8xf32>
    %118 = vector.broadcast %83 : vector<1x1x8xf32> to vector<1x8x8xf32>
    %119 = arith.addf %117, %118 : vector<1x8x8xf32>
    %cst_49 = arith.constant dense<0.000000e+00> : vector<1x8x8xf32>
    %120 = tpu.matmul %116, %106, %cst_49 {dimension_numbers = #tpu.dot_dimension_numbers<[2], [2], [1], [1], [0, 0, 0, 1, 1, 1], [0], [0]>} : vector<1x8x128xbf16>, vector<1x8x128xbf16>, vector<1x8x8xf32> -> vector<1x8x8xf32>
    %121 = vector.broadcast %83 : vector<1x1x8xf32> to vector<1x8x8xf32>
    %122 = arith.addf %120, %121 : vector<1x8x8xf32>
    %cst_50 = arith.constant dense<0xFF800000> : vector<1x8xf32>
    %123 = vector.multi_reduction <maximumf>, %119, %cst_50 [2] : vector<1x8x8xf32> to vector<1x8xf32>
    %124 = vector.shape_cast %123 : vector<1x8xf32> to vector<1x8x1xf32>
    %125 = vector.broadcast %124 : vector<1x8x1xf32> to vector<1x8x8xf32>
    %126 = arith.subf %119, %125 : vector<1x8x8xf32>
    %127 = math.exp %126 : vector<1x8x8xf32>
    %cst_51 = arith.constant dense<0.000000e+00> : vector<1x8xf32>
    %128 = vector.multi_reduction <add>, %127, %cst_51 [2] : vector<1x8x8xf32> to vector<1x8xf32>
    %129 = vector.shape_cast %128 : vector<1x8xf32> to vector<1x8x1xf32>
    %130 = tpu.reciprocal %129 {approx = true} : vector<1x8x1xf32> -> vector<1x8x1xf32>
    %131 = vector.broadcast %130 : vector<1x8x1xf32> to vector<1x8x8xf32>
    %132 = arith.mulf %127, %131 : vector<1x8x8xf32>
    %133 = arith.truncf %132 : vector<1x8x8xf32> to vector<1x8x8xbf16>
    %cst_52 = arith.constant dense<0xFF800000> : vector<1x8xf32>
    %134 = vector.multi_reduction <maximumf>, %122, %cst_52 [2] : vector<1x8x8xf32> to vector<1x8xf32>
    %135 = vector.shape_cast %134 : vector<1x8xf32> to vector<1x8x1xf32>
    %136 = vector.broadcast %135 : vector<1x8x1xf32> to vector<1x8x8xf32>
    %137 = arith.subf %122, %136 : vector<1x8x8xf32>
    %138 = math.exp %137 : vector<1x8x8xf32>
    %cst_53 = arith.constant dense<0.000000e+00> : vector<1x8xf32>
    %139 = vector.multi_reduction <add>, %138, %cst_53 [2] : vector<1x8x8xf32> to vector<1x8xf32>
    %140 = vector.shape_cast %139 : vector<1x8xf32> to vector<1x8x1xf32>
    %141 = tpu.reciprocal %140 {approx = true} : vector<1x8x1xf32> -> vector<1x8x1xf32>
    %142 = vector.broadcast %141 : vector<1x8x1xf32> to vector<1x8x8xf32>
    %143 = arith.mulf %138, %142 : vector<1x8x8xf32>
    %144 = arith.truncf %143 : vector<1x8x8xf32> to vector<1x8x8xbf16>
    %cst_54 = arith.constant dense<0.000000e+00> : vector<1x8x128xf32>
    %145 = tpu.matmul %133, %107, %cst_54 {dimension_numbers = #tpu.dot_dimension_numbers<[2], [1], [1], [2], [0, 0, 0, 1, 1, 2], [0], [0]>} : vector<1x8x8xbf16>, vector<1x8x128xbf16>, vector<1x8x128xf32> -> vector<1x8x128xf32>
    %cst_55 = arith.constant dense<0.000000e+00> : vector<1x8x128xf32>
    %146 = tpu.matmul %144, %106, %cst_55 {dimension_numbers = #tpu.dot_dimension_numbers<[2], [1], [1], [2], [0, 0, 0, 1, 1, 2], [0], [0]>} : vector<1x8x8xbf16>, vector<1x8x128xbf16>, vector<1x8x128xf32> -> vector<1x8x128xf32>
    %147 = arith.truncf %145 : vector<1x8x128xf32> to vector<1x8x128xbf16>
    %148 = arith.truncf %146 : vector<1x8x128xf32> to vector<1x8x128xbf16>
    %cst_56 = arith.constant dense<0.000000e+00> : vector<1x8x128xf32>
    %149 = tpu.matmul %6, %147, %cst_56 {dimension_numbers = #tpu.dot_dimension_numbers<[2], [1], [1], [2], [0, 0, 0, 1, 1, 2], [0], [0]>} : vector<1x8x8xbf16>, vector<1x8x128xbf16>, vector<1x8x128xf32> -> vector<1x8x128xf32>
    %cst_57 = arith.constant dense<0.000000e+00> : vector<1x8x128xf32>
    %150 = tpu.matmul %47, %148, %cst_57 {dimension_numbers = #tpu.dot_dimension_numbers<[2], [1], [1], [2], [0, 0, 0, 1, 1, 2], [0], [0]>} : vector<1x8x8xbf16>, vector<1x8x128xbf16>, vector<1x8x128xf32> -> vector<1x8x128xf32>
    %151 = tpu.concatenate %149, %150 in 2 : vector<1x8x128xf32>, vector<1x8x128xf32> -> vector<1x8x256xf32>
    %152 = vector.shape_cast %151 : vector<1x8x256xf32> to vector<8x256xf32>
    %153 = arith.truncf %152 : vector<8x256xf32> to vector<8x256xbf16>
    %c0_58 = arith.constant 0 : index
    %c0_59 = arith.constant 0 : index
    %154 = vector.load %arg11[%c0_58, %c0_59] : memref<256x256xbf16, #tpu.memory_space<vmem>>, vector<256x256xbf16>
    %cst_60 = arith.constant dense<0.000000e+00> : vector<8x256xf32>
    %155 = tpu.matmul %153, %154, %cst_60 {dimension_numbers = #tpu.dot_dimension_numbers<[1], [0], [0], [1], [0, 0, 1, 1], [], []>} : vector<8x256xbf16>, vector<256x256xbf16>, vector<8x256xf32> -> vector<8x256xf32>
    %c0_61 = arith.constant 0 : index
    %c0_62 = arith.constant 0 : index
    %156 = vector.load %arg12[%c0_61, %c0_62] : memref<1x256xf32, #tpu.memory_space<vmem>>, vector<1x256xf32>
    %157 = vector.broadcast %156 : vector<1x256xf32> to vector<8x256xf32>
    %158 = arith.addf %155, %157 : vector<8x256xf32>
    %159 = vector.shape_cast %158 : vector<8x256xf32> to vector<1x8x256xf32>
    %160 = vector.extract_strided_slice %159 {offsets = [0, 0, 0], sizes = [1, 8, 128], strides = [1, 1, 1]} : vector<1x8x256xf32> to vector<1x8x128xf32>
    %161 = vector.broadcast %72 : vector<1x8x1xf32> to vector<1x8x128xf32>
    %162 = arith.mulf %160, %161 : vector<1x8x128xf32>
    %cst_63 = arith.constant 0.000000e+00 : f32
    %163 = vector.broadcast %cst_63 : f32 to vector<1x8x128xf32>
    %164 = arith.maximumf %162, %163 : vector<1x8x128xf32>
    %165 = vector.extract_strided_slice %159 {offsets = [0, 0, 128], sizes = [1, 8, 128], strides = [1, 1, 1]} : vector<1x8x256xf32> to vector<1x8x128xf32>
    %166 = vector.broadcast %77 : vector<1x8x1xf32> to vector<1x8x128xf32>
    %167 = arith.mulf %165, %166 : vector<1x8x128xf32>
    %cst_64 = arith.constant 0.000000e+00 : f32
    %168 = vector.broadcast %cst_64 : f32 to vector<1x8x128xf32>
    %169 = arith.maximumf %167, %168 : vector<1x8x128xf32>
    %170 = arith.truncf %164 : vector<1x8x128xf32> to vector<1x8x128xbf16>
    %171 = arith.truncf %169 : vector<1x8x128xf32> to vector<1x8x128xbf16>
    %172 = tpu.concatenate %164, %169 in 2 : vector<1x8x128xf32>, vector<1x8x128xf32> -> vector<1x8x256xf32>
    %173 = vector.shape_cast %172 : vector<1x8x256xf32> to vector<8x256xf32>
    %174 = arith.truncf %173 : vector<8x256xf32> to vector<8x256xbf16>
    %cst_65 = arith.constant dense<0.000000e+00> : vector<8x256xf32>
    %175 = tpu.matmul %174, %84, %cst_65 {dimension_numbers = #tpu.dot_dimension_numbers<[1], [0], [0], [1], [0, 0, 1, 1], [], []>} : vector<8x256xbf16>, vector<256x256xbf16>, vector<8x256xf32> -> vector<8x256xf32>
    %176 = vector.shape_cast %175 : vector<8x256xf32> to vector<1x8x256xf32>
    %177 = vector.extract_strided_slice %176 {offsets = [0, 0, 0], sizes = [1, 8, 128], strides = [1, 1, 1]} : vector<1x8x256xf32> to vector<1x8x128xf32>
    %178 = arith.truncf %177 : vector<1x8x128xf32> to vector<1x8x128xbf16>
    %179 = vector.extract_strided_slice %176 {offsets = [0, 0, 128], sizes = [1, 8, 128], strides = [1, 1, 1]} : vector<1x8x256xf32> to vector<1x8x128xf32>
    %180 = arith.truncf %179 : vector<1x8x128xf32> to vector<1x8x128xbf16>
    %cst_66 = arith.constant dense<0.000000e+00> : vector<1x8x8xf32>
    %181 = tpu.matmul %178, %171, %cst_66 {dimension_numbers = #tpu.dot_dimension_numbers<[2], [2], [1], [1], [0, 0, 0, 1, 1, 1], [0], [0]>} : vector<1x8x128xbf16>, vector<1x8x128xbf16>, vector<1x8x8xf32> -> vector<1x8x8xf32>
    %182 = vector.broadcast %83 : vector<1x1x8xf32> to vector<1x8x8xf32>
    %183 = arith.addf %181, %182 : vector<1x8x8xf32>
    %cst_67 = arith.constant dense<0.000000e+00> : vector<1x8x8xf32>
    %184 = tpu.matmul %180, %170, %cst_67 {dimension_numbers = #tpu.dot_dimension_numbers<[2], [2], [1], [1], [0, 0, 0, 1, 1, 1], [0], [0]>} : vector<1x8x128xbf16>, vector<1x8x128xbf16>, vector<1x8x8xf32> -> vector<1x8x8xf32>
    %185 = vector.broadcast %83 : vector<1x1x8xf32> to vector<1x8x8xf32>
    %186 = arith.addf %184, %185 : vector<1x8x8xf32>
    %cst_68 = arith.constant dense<0xFF800000> : vector<1x8xf32>
    %187 = vector.multi_reduction <maximumf>, %183, %cst_68 [2] : vector<1x8x8xf32> to vector<1x8xf32>
    %188 = vector.shape_cast %187 : vector<1x8xf32> to vector<1x8x1xf32>
    %189 = vector.broadcast %188 : vector<1x8x1xf32> to vector<1x8x8xf32>
    %190 = arith.subf %183, %189 : vector<1x8x8xf32>
    %191 = math.exp %190 : vector<1x8x8xf32>
    %cst_69 = arith.constant dense<0.000000e+00> : vector<1x8xf32>
    %192 = vector.multi_reduction <add>, %191, %cst_69 [2] : vector<1x8x8xf32> to vector<1x8xf32>
    %193 = vector.shape_cast %192 : vector<1x8xf32> to vector<1x8x1xf32>
    %194 = tpu.reciprocal %193 {approx = true} : vector<1x8x1xf32> -> vector<1x8x1xf32>
    %195 = vector.broadcast %194 : vector<1x8x1xf32> to vector<1x8x8xf32>
    %196 = arith.mulf %191, %195 : vector<1x8x8xf32>
    %197 = arith.truncf %196 : vector<1x8x8xf32> to vector<1x8x8xbf16>
    %cst_70 = arith.constant dense<0xFF800000> : vector<1x8xf32>
    %198 = vector.multi_reduction <maximumf>, %186, %cst_70 [2] : vector<1x8x8xf32> to vector<1x8xf32>
    %199 = vector.shape_cast %198 : vector<1x8xf32> to vector<1x8x1xf32>
    %200 = vector.broadcast %199 : vector<1x8x1xf32> to vector<1x8x8xf32>
    %201 = arith.subf %186, %200 : vector<1x8x8xf32>
    %202 = math.exp %201 : vector<1x8x8xf32>
    %cst_71 = arith.constant dense<0.000000e+00> : vector<1x8xf32>
    %203 = vector.multi_reduction <add>, %202, %cst_71 [2] : vector<1x8x8xf32> to vector<1x8xf32>
    %204 = vector.shape_cast %203 : vector<1x8xf32> to vector<1x8x1xf32>
    %205 = tpu.reciprocal %204 {approx = true} : vector<1x8x1xf32> -> vector<1x8x1xf32>
    %206 = vector.broadcast %205 : vector<1x8x1xf32> to vector<1x8x8xf32>
    %207 = arith.mulf %202, %206 : vector<1x8x8xf32>
    %208 = arith.truncf %207 : vector<1x8x8xf32> to vector<1x8x8xbf16>
    %cst_72 = arith.constant dense<0.000000e+00> : vector<1x8x128xf32>
    %209 = tpu.matmul %197, %171, %cst_72 {dimension_numbers = #tpu.dot_dimension_numbers<[2], [1], [1], [2], [0, 0, 0, 1, 1, 2], [0], [0]>} : vector<1x8x8xbf16>, vector<1x8x128xbf16>, vector<1x8x128xf32> -> vector<1x8x128xf32>
    %cst_73 = arith.constant dense<0.000000e+00> : vector<1x8x128xf32>
    %210 = tpu.matmul %208, %170, %cst_73 {dimension_numbers = #tpu.dot_dimension_numbers<[2], [1], [1], [2], [0, 0, 0, 1, 1, 2], [0], [0]>} : vector<1x8x8xbf16>, vector<1x8x128xbf16>, vector<1x8x128xf32> -> vector<1x8x128xf32>
    %cst_74 = arith.constant dense<0.000000e+00> : vector<1x1xf32>
    %211 = vector.multi_reduction <add>, %5, %cst_74 [1] : vector<1x8x1xf32> to vector<1x1xf32>
    %cst_75 = arith.constant 1.000000e+00 : f32
    %212 = vector.broadcast %cst_75 : f32 to vector<1x1xf32>
    %213 = arith.divf %212, %211 : vector<1x1xf32>
    %214 = vector.broadcast %5 : vector<1x8x1xf32> to vector<1x8x128xf32>
    %215 = arith.mulf %210, %214 : vector<1x8x128xf32>
    %cst_76 = arith.constant dense<0.000000e+00> : vector<1x128xf32>
    %216 = vector.multi_reduction <add>, %215, %cst_76 [1] : vector<1x8x128xf32> to vector<1x128xf32>
    %217 = vector.broadcast %213 : vector<1x1xf32> to vector<1x128xf32>
    %218 = arith.mulf %216, %217 : vector<1x128xf32>
    %219 = vector.broadcast %5 : vector<1x8x1xf32> to vector<1x8x128xf32>
    %220 = arith.mulf %209, %219 : vector<1x8x128xf32>
    %cst_77 = arith.constant dense<0.000000e+00> : vector<1x128xf32>
    %221 = vector.multi_reduction <add>, %220, %cst_77 [1] : vector<1x8x128xf32> to vector<1x128xf32>
    %222 = vector.broadcast %213 : vector<1x1xf32> to vector<1x128xf32>
    %223 = arith.mulf %221, %222 : vector<1x128xf32>
    %224 = tpu.concatenate %218, %223 in 1 : vector<1x128xf32>, vector<1x128xf32> -> vector<1x256xf32>
    %225 = arith.truncf %224 : vector<1x256xf32> to vector<1x256xbf16>
    %c0_78 = arith.constant 0 : index
    %c0_79 = arith.constant 0 : index
    %226 = vector.load %arg14[%c0_78, %c0_79] : memref<256x128xbf16, #tpu.memory_space<vmem>>, vector<256x128xbf16>
    %cst_80 = arith.constant dense<0.000000e+00> : vector<1x128xf32>
    %227 = tpu.matmul %225, %226, %cst_80 {dimension_numbers = #tpu.dot_dimension_numbers<[1], [0], [0], [1], [0, 0, 1, 1], [], []>} : vector<1x256xbf16>, vector<256x128xbf16>, vector<1x128xf32> -> vector<1x128xf32>
    %c0_81 = arith.constant 0 : index
    %c0_82 = arith.constant 0 : index
    %228 = vector.load %arg15[%c0_81, %c0_82] : memref<1x128xf32, #tpu.memory_space<vmem>>, vector<1x128xf32>
    %229 = arith.addf %227, %228 : vector<1x128xf32>
    %c0_83 = arith.constant 0 : index
    %c0_84 = arith.constant 0 : index
    %c0_85 = arith.constant 0 : index
    %230 = vector.load %arg16[%c0_83, %c0_84, %c0_85] : memref<1x1x128xf32, #tpu.memory_space<vmem>>, vector<1x1x128xf32>
    %231 = vector.shape_cast %230 : vector<1x1x128xf32> to vector<1x128xf32>
    %232 = vector.shape_cast %229 : vector<1x128xf32> to vector<1x1x128xf32>
    tpu.vector_store %arg16[%c0_83, %c0_84, %c0_85], %232 {strides = array<i32>} : memref<1x1x128xf32, #tpu.memory_space<vmem>>, vector<1x1x128xf32>,
    %233 = tpu.iota {dimensions = array<i32: 1>} : vector<1x128xi32>
    %c0_i32 = arith.constant 0 : i32
    %234 = vector.broadcast %c0_i32 : i32 to vector<1x128xi32>
    %235 = arith.cmpi eq, %233, %234 : vector<1x128xi32>
    %c1_i32 = arith.constant 1 : i32
    %236 = vector.broadcast %c1_i32 : i32 to vector<1x128xi32>
    %237 = arith.cmpi eq, %233, %236 : vector<1x128xi32>
    %cst_86 = arith.constant 0.000000e+00 : f32
    %238 = vector.broadcast %67 : f32 to vector<1x128xf32>
    %239 = vector.broadcast %cst_86 : f32 to vector<1x128xf32>
    %240 = arith.select %237, %238, %239 : vector<1x128xi1>, vector<1x128xf32>
    %241 = vector.broadcast %61 : f32 to vector<1x128xf32>
    %242 = arith.select %235, %241, %240 : vector<1x128xi1>, vector<1x128xf32>
    %c0_87 = arith.constant 0 : index
    %c0_88 = arith.constant 0 : index
    %c0_89 = arith.constant 0 : index
    %243 = vector.load %arg17[%c0_87, %c0_88, %c0_89] : memref<1x1x128xf32, #tpu.memory_space<vmem>>, vector<1x1x128xf32>
    %244 = vector.shape_cast %243 : vector<1x1x128xf32> to vector<1x128xf32>
    %245 = vector.shape_cast %242 : vector<1x128xf32> to vector<1x1x128xf32>
    tpu.vector_store %arg17[%c0_87, %c0_88, %c0_89], %245 {strides = array<i32>} : memref<1x1x128xf32, #tpu.memory_space<vmem>>, vector<1x1x128xf32>,
    return
  }
  func.func @transform_0(%arg0: i32) -> (i32, i32, i32) {
    %c0_i32 = arith.constant 0 : i32
    %c0_i32_0 = arith.constant 0 : i32
    %c0_i32_1 = arith.constant 0 : i32
    return %arg0, %c0_i32, %c0_i32_0 : i32, i32, i32
  }
  func.func @transform_1(%arg0: i32) -> (i32, i32, i32) {
    %c0_i32 = arith.constant 0 : i32
    %c0_i32_0 = arith.constant 0 : i32
    %c0_i32_1 = arith.constant 0 : i32
    return %arg0, %c0_i32, %c0_i32_0 : i32, i32, i32
  }
  func.func @transform_2(%arg0: i32) -> (i32, i32, i32) {
    %c0_i32 = arith.constant 0 : i32
    %c0_i32_0 = arith.constant 0 : i32
    %c0_i32_1 = arith.constant 0 : i32
    return %arg0, %c0_i32, %c0_i32_0 : i32, i32, i32
  }
  func.func @transform_3(%arg0: i32) -> (i32, i32, i32) {
    %c0_i32 = arith.constant 0 : i32
    %c0_i32_0 = arith.constant 0 : i32
    %c0_i32_1 = arith.constant 0 : i32
    return %arg0, %c0_i32, %c0_i32_0 : i32, i32, i32
  }
  func.func @transform_4(%arg0: i32) -> (i32, i32) {
    %c0_i32 = arith.constant 0 : i32
    %c0_i32_0 = arith.constant 0 : i32
    %c0_i32_1 = arith.constant 0 : i32
    return %c0_i32, %c0_i32_0 : i32, i32
  }
  func.func @transform_5(%arg0: i32) -> (i32, i32) {
    %c0_i32 = arith.constant 0 : i32
    %c0_i32_0 = arith.constant 0 : i32
    %c0_i32_1 = arith.constant 0 : i32
    return %c0_i32, %c0_i32_0 : i32, i32
  }
  func.func @transform_6(%arg0: i32) -> (i32, i32) {
    %c0_i32 = arith.constant 0 : i32
    %c0_i32_0 = arith.constant 0 : i32
    %c0_i32_1 = arith.constant 0 : i32
    return %c0_i32, %c0_i32_0 : i32, i32
  }
  func.func @transform_7(%arg0: i32) -> (i32, i32) {
    %c0_i32 = arith.constant 0 : i32
    %c0_i32_0 = arith.constant 0 : i32
    %c0_i32_1 = arith.constant 0 : i32
    return %c0_i32, %c0_i32_0 : i32, i32
  }
  func.func @transform_8(%arg0: i32) -> (i32, i32) {
    %c0_i32 = arith.constant 0 : i32
    %c0_i32_0 = arith.constant 0 : i32
    %c0_i32_1 = arith.constant 0 : i32
    return %c0_i32, %c0_i32_0 : i32, i32
  }
  func.func @transform_9(%arg0: i32) -> (i32, i32) {
    %c0_i32 = arith.constant 0 : i32
    %c0_i32_0 = arith.constant 0 : i32
    %c0_i32_1 = arith.constant 0 : i32
    return %c0_i32, %c0_i32_0 : i32, i32
  }
  func.func @transform_10(%arg0: i32) -> (i32, i32) {
    %c0_i32 = arith.constant 0 : i32
    %c0_i32_0 = arith.constant 0 : i32
    %c0_i32_1 = arith.constant 0 : i32
    return %c0_i32, %c0_i32_0 : i32, i32
  }
  func.func @transform_11(%arg0: i32) -> (i32, i32) {
    %c0_i32 = arith.constant 0 : i32
    %c0_i32_0 = arith.constant 0 : i32
    %c0_i32_1 = arith.constant 0 : i32
    return %c0_i32, %c0_i32_0 : i32, i32
  }
  func.func @transform_12(%arg0: i32) -> (i32, i32) {
    %c0_i32 = arith.constant 0 : i32
    %c0_i32_0 = arith.constant 0 : i32
    %c0_i32_1 = arith.constant 0 : i32
    return %c0_i32, %c0_i32_0 : i32, i32
  }
  func.func @transform_13(%arg0: i32) -> (i32, i32) {
    %c0_i32 = arith.constant 0 : i32
    %c0_i32_0 = arith.constant 0 : i32
    %c0_i32_1 = arith.constant 0 : i32
    return %c0_i32, %c0_i32_0 : i32, i32
  }
  func.func @transform_14(%arg0: i32) -> (i32, i32) {
    %c0_i32 = arith.constant 0 : i32
    %c0_i32_0 = arith.constant 0 : i32
    %c0_i32_1 = arith.constant 0 : i32
    return %c0_i32, %c0_i32_0 : i32, i32
  }
  func.func @transform_15(%arg0: i32) -> (i32, i32, i32) {
    %c0_i32 = arith.constant 0 : i32
    %c0_i32_0 = arith.constant 0 : i32
    %c0_i32_1 = arith.constant 0 : i32
    return %arg0, %c0_i32, %c0_i32_0 : i32, i32, i32
  }
  func.func @transform_16(%arg0: i32) -> (i32, i32, i32) {
    %c0_i32 = arith.constant 0 : i32
    %c0_i32_0 = arith.constant 0 : i32
    %c0_i32_1 = arith.constant 0 : i32
    return %arg0, %c0_i32, %c0_i32_0 : i32, i32, i32
  }
}

</mosaic_0001>

<bundles_post_ra>
// kernel: tpu_custom_call.1
= control target key start
LH: loop header
LB: loop body
LE: loop exit
PB: predicated region body
PF: predicated region fallthrough
CT: control target
= control target key end

     0   :  { %s4078_s0 = inlined_call_operand.vmem [shape: bf16[2,8,128], index: 0, kind: input, shape index: {}]   ;;  %s4079_s1 = inlined_call_operand.vmem [shape: f32[2,1,8], index: 1, kind: input, shape index: {}]   ;;  %s4080_s2 = inlined_call_operand.vmem [shape: f32[2,8,2], index: 2, kind: input, shape index: {}]   ;;  %s4081_s3 = inlined_call_operand.vmem [shape: bf16[2,8,8], index: 3, kind: input, shape index: {}]   ;;  %s4082_s4 = inlined_call_operand.hbm [shape: f32[8,8], index: 4, kind: input, shape index: {}]   ;;  %s4083_s5 = inlined_call_operand.hbm [shape: f32[1,8], index: 5, kind: input, shape index: {}]   ;;  %s4084_s6 = inlined_call_operand.hbm [shape: bf16[128,256], index: 6, kind: input, shape index: {}]   ;;  %s4085_s7 = inlined_call_operand.vmem [shape: f32[1,256], index: 7, kind: input, shape index: {}]   ;;  %s4086_s8 = inlined_call_operand.hbm [shape: bf16[256,256], index: 8, kind: input, shape index: {}]   ;;  %s4087_s9 = inlined_call_operand.vmem [shape: f32[1,256], index: 9, kind: input, shape index: {}]   ;;  %s4088_s10 = inlined_call_operand.hbm [shape: bf16[256,256], index: 10, kind: input, shape index: {}]   ;;  %s4089_s11 = inlined_call_operand.vmem [shape: f32[1,256], index: 11, kind: input, shape index: {}]   ;;  %s4090_s12 = inlined_call_operand.hbm [shape: bf16[256,256], index: 12, kind: input, shape index: {}]   ;;  %s4091_s13 = inlined_call_operand.hbm [shape: bf16[256,128], index: 13, kind: input, shape index: {}]   ;;  %s4092_s14 = inlined_call_operand.vmem [shape: f32[1,128], index: 14, kind: input, shape index: {}]   ;;  %s4093_s15 = inlined_call_operand.hbm [shape: f32[2,1,128], index: 15, kind: output, shape index: {0}]   ;;  %s4094_s16 = inlined_call_operand.hbm [shape: f32[2,1,128], index: 16, kind: output, shape index: {1}]  }
   0x1   :  { %4102 = sst [smem:[#allocation29_spill]] %s4078_s0 }
   0x2   :  { %4103 = sst [smem:[#allocation30_spill]] %s4083_s5 }
   0x3   :  { %4104 = sst [smem:[#allocation31_spill]] %s4086_s8 }
   0x4   :  { %4105 = sst [smem:[#allocation32_spill]] %s4090_s12 }
   0x5   :  { %4106 = sst [smem:[#allocation33_spill]] %s4092_s14 }
   0x6   :  { %4107 = sst [smem:[#allocation34_spill]] %s4093_s15 }
   0x7   :  { %22 = vsyncpa [#allocation3], 0 }
   0x8   :  { %23 = vsyncpa [#allocation6], 0 }
   0x9   :  { %24 = vsyncpa [#allocation9], 0 }
   0xa   :  { %25 = vsyncpa [#allocation12], 0 }
   0xb   :  { %26 = vsyncpa [#allocation4], 0 }
   0xc   :  { %28 = vsyncpa [#allocation4 + $0x1], 0 }
   0xd   :  { %29 = vsyncpa [#allocation16], 0 }
   0xe   :  { %31 = vsyncpa [#allocation16 + $0x1], 0  ;;  %s3659_s21 = smov 0   ;;  %s3661_s22 = smov 0  }
   0xf   :  { %s3663_s23 = smov 0   ;;  %s3665_s24 = smov 0  }
  0x10 LB: > { %4108 = sst [smem:[#allocation23_spill]] %s3547_s21  ;;  %s3680_s25 = sadd.s32 4294967295, %s3559_s24   ;;  %s3559_s24 = sphi %s3665_s24, %s4128_s24   ;;  %s3555_s23 = sphi %s3663_s23, %s4130_s23   ;;  %s3551_s22 = sphi %s3661_s22, %s4132_s22   ;;  %s3547_s21 = sphi %s3659_s21, %s4131_s21  }
  0x11   : > { %4109 = sst [smem:[#allocation24_spill]] %s3555_s23  ;;  %s2411_s26 = sadd.s32 4294967294, %s3559_s24  }
  0x12   : > { %4110 = sst [smem:[#allocation25_spill]] %s3559_s24  ;;  %s3684_s27 = sadd.s32 1, %s3559_s24  }
  0x13   : > { %4111 = sst [smem:[#allocation26_spill]] %s3684_s27  ;;  %s379_s28 = sadd.s32 1, %s3555_s23 }
  0x14   : > { %s376_s29 = ssub.s32 %s3559_s24, %s3684_s27  ;;  %p389_p0 = scmp.ne.s32.totalorder %s3555_s23, %s3551_s22 }
  0x15   : > { %p377_p1 = scmp.eq.s32.totalorder %s376_s29, 0  ;;  %p390_p2 = scmp.eq.s32.totalorder %s3680_s25, 1 }
  0x16   : > { %p395_p3 = scmp.ne.s32.totalorder %s3551_s22, %s3547_s21  ;;  %p396_p4 = scmp.eq.s32.totalorder %s2411_s26, 1 }
  0x17   : > { %s3695_s30 = scalar_select %p377_p1, %s3555_s23, %s379_s28  }
  0x18   : > { %p3697_p5 = por %p390_p2, %p389_p0  ;;  %p3701_p6 = por %p396_p4, %p395_p3 }
  0x19   : > { %4112 = sst [smem:[#allocation27_spill]] %s3695_s30  ;;  %p2412_p7 = scmp.ge.s32.totalorder %s3559_s24, 1 }
  0x1a   : > { %s4114_s17 = scalar_select %p3701_p6, 1, 0 }
  0x1b   : > { %p429_p8 = scmp.lt.s32.totalorder %s3559_s24, 3  ;;  %p3149_p9 = scmp.eq.s32.totalorder %s3680_s25, 0 }
  0x1c   : > { %4115 = sst [smem:[#allocation28_spill]] %s4114_s17  ;;  %s3561_s28 = smov [#allocation5]  }
  0x1d   : > { %p3708_p10 = pnand %p2412_p7, %p429_p8  ;;  %s4117_s5 = sld [smem:[#allocation30_spill]] }
  0x1e   : > { %s455_s29 = sshll.u32 %s3561_s28, 4  ;;  %s4119_s8 = sld [smem:[#allocation31_spill]]  ;;  %s456_s29 = int_to_ptr.vmem [resolvable:$true] %s455_s29 }
  0x1f   : > { %p3120_p11 = pneg %p3708_p10  ;;  %s3562_s19 = smov [#allocation8]  }
  0x20   : > { %s483_s20 = sshll.u32 %s3562_s19, 4  ;;  %s4120_s12 = sld [smem:[#allocation32_spill]]  ;;  %s484_s20 = int_to_ptr.vmem [resolvable:$true] %s483_s20 }
  0x21   : > { %p3719_p12 = pnand %p3149_p9, %p3120_p11  ;;  %s3563_s24 = smov 128  }
  0x22   : > { %s3564_s14 = smov 8   ;;  %s3565_s15 = smov [#allocation11]  }
  0x23   : > { %s453_s26 = sshll.u32 %s4117_s5, 4  ;;  %s3566_s5 = smov [#allocation2]   ;;  %s454_s26 = int_to_ptr.hbm [resolvable:$true] %s453_s26 }
  0x24   : > { %s481_s17 = sshll.u32 %s4119_s8, 4  ;;  %s441_s8 = sshll.u32 %s4082_s4, 4  ;;  %s482_s17 = int_to_ptr.hbm [resolvable:$true] %s481_s17  ;;  %s442_s8 = int_to_ptr.hbm [resolvable:$true] %s441_s8 }
  0x25   : > { %3126 = dma.hbm_to_vmem [thread:$0]  (!%p3719_p12), %s454_s26, 16, %s456_s29, [#allocation6]  }
  0x26   : > { %s515_s21 = sshll.u32 %s4120_s12, 4  ;;  %s517_s26 = sshll.u32 %s3565_s15, 4  ;;  %s516_s21 = int_to_ptr.hbm [resolvable:$true] %s515_s21  ;;  %s518_s26 = int_to_ptr.vmem [resolvable:$true] %s517_s26 }
  0x27   : > { %3132 = dma.hbm_to_vmem [thread:$0]  (!%p3719_p12), %s482_s17, 4096, %s484_s20, [#allocation9], %s3563_s24, %s3563_s24, %s3564_s14  }
  0x28   : > { %3138 = dma.hbm_to_vmem [thread:$0]  (!%p3719_p12), %s516_s21, 4096, %s518_s26, [#allocation12], %s3563_s24, %s3563_s24, %s3564_s14  }
  0x29   : > { %s443_s29 = sshll.u32 %s3566_s5, 4  ;;  %s464_s12 = sshll.u32 %s4084_s6, 4  ;;  %s444_s29 = int_to_ptr.vmem [resolvable:$true] %s443_s29  ;;  %s465_s12 = int_to_ptr.hbm [resolvable:$true] %s464_s12 }
  0x2a   : > { %3123 = dma.hbm_to_vmem [thread:$0]  (!%p3719_p12), %s442_s8, 128, %s444_s29, [#allocation3]  }
  0x2b   : > { %s498_s23 = sshll.u32 %s4088_s10, 4  ;;  %s3567_s15 = smov [#allocation7]   ;;  %s499_s23 = int_to_ptr.hbm [resolvable:$true] %s498_s23 }
  0x2c   : > { %s466_s27 = sshll.u32 %s3567_s15, 4  ;;  %s3568_s21 = smov [#allocation10]   ;;  %s467_s27 = int_to_ptr.vmem [resolvable:$true] %s466_s27 }
  0x2d   : > { %3129 = dma.hbm_to_vmem [thread:$0]  (!%p3719_p12), %s465_s12, 2048, %s467_s27, [#allocation6], %s3563_s24, %s3563_s24, %s3564_s14  }
  0x2e   : > { %s500_s26 = sshll.u32 %s3568_s21, 4  ;;  %s529_s28 = sshll.u32 %s4091_s13, 4  ;;  %s501_s26 = int_to_ptr.vmem [resolvable:$true] %s500_s26  ;;  %s530_s28 = int_to_ptr.hbm [resolvable:$true] %s529_s28 }
  0x2f   : > { %3135 = dma.hbm_to_vmem [thread:$0]  (!%p3719_p12), %s499_s23, 4096, %s501_s26, [#allocation9], %s3563_s24, %s3563_s24, %s3564_s14  }
  0x30   : > { %s3569_s8 = smov [#allocation13]   ;;  %s3570_s17 = smov 64  }
  0x31   : > { %s531_s29 = sshll.u32 %s3569_s8, 4  ;;  %s3571_s20 = smov 4   ;;  %s532_s29 = int_to_ptr.vmem [resolvable:$true] %s531_s29 }
  0x32   : > { %3141 = dma.hbm_to_vmem [thread:$0]  (!%p3719_p12), %s530_s28, 2048, %s532_s29, [#allocation12], %s3570_s17, %s3570_s17, %s3571_s20  }
  0x33   : > { %577 = sbr.rel (%p3708_p10) target bundleno = 2674 (0xa72), region = 80 }
  0x38   : > { %3522 = dma.done.wait (%p3149_p9), [#allocation3], 128  }
  0x39   : > { %3524 = vsyncadd (%p3149_p9), [#allocation3], 4294967168 }
  0x3a   : > { %3526 = dma.done.wait (%p3149_p9), [#allocation6], 2064  }
  0x3b   : > { %3528 = vsyncadd (%p3149_p9), [#allocation6], 4294965232 }
  0x3c   : > { %3530 = dma.done.wait (%p3149_p9), [#allocation9], 8192  }
  0x3d   : > { %3532 = vsyncadd (%p3149_p9), [#allocation9], 4294959104 }
  0x3e   : > { %3534 = dma.done.wait (%p3149_p9), [#allocation12], 6144  }
  0x3f   : > { %3536 = vsyncadd (%p3149_p9), [#allocation12], 4294961152  ;;  %v2490_v0 = vld [vmem:[#allocation7 + $0x70] sm:$0xf]  ;;  %v2971_v1 = vld [vmem:[#allocation7 + $0x74] sm:$0xf0] }
  0x40   : > { %v2970_v2 = vld [vmem:[#allocation7 + $0x74] sm:$0xf]  ;;  %v2491_v3 = vor.u32 %v2971_v1, %v2490_v0  ;;  %v2492_v4 = vld [vmem:[#allocation7 + $0x78] sm:$0xf0]  ;;  %v2482_v5 = vld [vmem:[#allocation7 + $0x60] sm:$0xf] }
  0x41   : > { %v2969_v6 = vld [vmem:[#allocation7 + $0x64] sm:$0xf0]  ;;  %v2495_v7 = vor.u32 %v2970_v2, %v2492_v4  ;;  %v2968_v8 = vld [vmem:[#allocation7 + $0x64] sm:$0xf]  ;;  %v2484_v9 = vld [vmem:[#allocation7 + $0x68] sm:$0xf0] }
  0x42   : > { %795 = vmatpush.bf16.msra.mxu0 %v2491_v3  ;;  %v2483_v10 = vor.u32 %v2969_v6, %v2482_v5  ;;  %v2487_v11 = vor.u32 %v2968_v8, %v2484_v9  ;;  %v2474_v12 = vld [vmem:[#allocation7 + $0x50] sm:$0xf]  ;;  %v2967_v13 = vld [vmem:[#allocation7 + $0x54] sm:$0xf0]  ;;  %v2966_v14 = vld [vmem:[#allocation7 + $0x54] sm:$0xf] }
  0x43   : > { %808 = vmatpush.bf16.msra.mxu1 %v2495_v7  ;;  %v2476_v15 = vld [vmem:[#allocation7 + $0x58] sm:$0xf0]  ;;  %v2475_v16 = vor.u32 %v2967_v13, %v2474_v12  ;;  %v2466_v18 = vld [vmem:[#allocation7 + $0x40] sm:$0xf]  ;;  %v2965_v19 = vld [vmem:[#allocation7 + $0x44] sm:$0xf0] }
  0x44   : > { %v2479_v17 = vor.u32 %v2966_v14, %v2476_v15  ;;  %v2964_v20 = vld [vmem:[#allocation7 + $0x44] sm:$0xf]  ;;  %v2468_v21 = vld [vmem:[#allocation7 + $0x48] sm:$0xf0]  ;;  %v2467_v22 = vor.u32 %v2965_v19, %v2466_v18  ;;  %v2458_v24 = vld [vmem:[#allocation7 + $0x30] sm:$0xf] }
  0x45   : > { %v2471_v23 = vor.u32 %v2964_v20, %v2468_v21  ;;  %v2963_v25 = vld [vmem:[#allocation7 + $0x34] sm:$0xf0]  ;;  %v2962_v26 = vld [vmem:[#allocation7 + $0x34] sm:$0xf]  ;;  %v2460_v27 = vld [vmem:[#allocation7 + $0x38] sm:$0xf0] }
  0x46   : > { %796 = vmatpush.bf16.msra.mxu0 %v2483_v10  ;;  %v2459_v28 = vor.u32 %v2963_v25, %v2458_v24  ;;  %v2463_v29 = vor.u32 %v2962_v26, %v2460_v27  ;;  %v2450_v30 = vld [vmem:[#allocation7 + $0x20] sm:$0xf]  ;;  %v2961_v31 = vld [vmem:[#allocation7 + $0x24] sm:$0xf0]  ;;  %v2960_v32 = vld [vmem:[#allocation7 + $0x24] sm:$0xf] }
  0x47   : > { %809 = vmatpush.bf16.msra.mxu1 %v2487_v11  ;;  %v2452_v33 = vld [vmem:[#allocation7 + $0x28] sm:$0xf0]  ;;  %p671_p13 = scmp.lt.s32.totalorder %s3680_s25, 1  ;;  %v2451_v34 = vor.u32 %v2961_v31, %v2450_v30  ;;  %v2442_v36 = vld [vmem:[#allocation7 + $0x10] sm:$0xf]  ;;  %s4121_s18 = sld [smem:[#allocation29_spill]] }
  0x48   : > { %v2455_v35 = vor.u32 %v2960_v32, %v2452_v33  ;;  %v2959_v37 = vld [vmem:[#allocation7 + $0x14] sm:$0xf0]  ;;  %v2958_v38 = vld [vmem:[#allocation7 + $0x14] sm:$0xf]  ;;  %v2444_v39 = vld [vmem:[#allocation7 + $0x18] sm:$0xf0] }
  0x49   : > { %s3775_s12 = scalar_select %p671_p13, %s3680_s25, 1  ;;  %v2443_v40 = vor.u32 %v2959_v37, %v2442_v36  ;;  %v2447_v41 = vor.u32 %v2958_v38, %v2444_v39  ;;  %v2434_v42 = vld [vmem:[#allocation7] sm:$0xf]  ;;  %v2957_v43 = vld [vmem:[#allocation7 + $0x4] sm:$0xf0]  ;;  %v3572_v60 = vmov 0  }
  0x4a   : > { %797 = vmatpush.bf16.msra.mxu0 %v2475_v16  ;;  %v2956_v44 = vld [vmem:[#allocation7 + $0x4] sm:$0xf]  ;;  %v2436_v45 = vld [vmem:[#allocation7 + $0x8] sm:$0xf0]  ;;  %v2435_v46 = vor.u32 %v2957_v43, %v2434_v42  ;;  %v709_v49 = vld [vmem:[%s4085_s7] sm:$0x3]  ;;  %3209 = vset.pattern.permute.xlu1 %v3572_v60 }
  0x4b   : > { %810 = vmatpush.bf16.msra.mxu1 %v2479_v17  ;;  %s2429_s14 = sshll.u32 %s3775_s12, 2  ;;  %v2439_v47 = vor.u32 %v2956_v44, %v2436_v45  ;;  %v712_v50 = vperm.slane %v709_v49, 1  ;;  %v711_v52 = vperm.slane %v709_v49, 0  ;;  %s677_s5 = scalar_lea.vmem %s4079_s1, %s3775_s12  ;;  %vm842_vm2 = vcmask 64512   ;;  %v3809_v14 = vld [vmem:[#allocation2] sm:$0xff] }
  0x4c   : > { %v689_v61 = vld [vmem:[%s677_s5] sm:$0x1]  ;;  %s2430_s19 = sshll.u32 %s3775_s12, 3  ;;  %vm954_vm3 = vcmask 1043456   ;;  %s685_s24 = scalar_lea.vmem %s4081_s3, %s2429_s14  ;;  %v854_v15 = vsub.f32 1.0, %v3809_v14  ;;  %vm1981_vm6 = vcmask 15368  }
  0x4d   : > { %s674_s23 = scalar_lea.vmem %s4121_s18, %s2429_s14  ;;  %vm837_vm0 = vcmp.eq.f32.partialorder %v689_v61, 0.0  ;;  %s3795_s29 = scalar_lea.vmem %s4080_s2, %s2430_s19  ;;  %v3805_v12 = vld [vmem:[%s685_s24] sm:$0xf]  ;;  %v2558_v25 = vld [vmem:[#allocation8 + $0x70] sm:$0xf] }
  0x4e   : > { %798 = vmatpush.bf16.msra.mxu0 %v2467_v22  ;;  %v687_v48 = vld [vmem:[%s674_s23] sm:$0xf]  ;;  %v838_v62 = vsel %vm837_vm0, 1, %v3572_v60  ;;  %v2550_v31 = vld [vmem:[#allocation8 + $0x60] sm:$0xf]  ;;  %s3956_s30 = sand.u32 1, %s3551_s22   ;;  %s2222_s19 = scalar_lea.hbm %s4094_s16, %s3680_s25 }
  0x4f   : > { %811 = vmatpush.bf16.msra.mxu1 %v2471_v23  ;;  %v839_v63 = vperm.slane %v838_v62, 0  ;;  %v690_v5 = vld [vmem:[%s3795_s29] sm:$0xff]  ;;  %v956_v11 = vsel %vm954_vm3, %v687_v48, 0  ;;  %v3017_v32 = vld [vmem:[#allocation8 + $0x64] sm:$0xf0]  ;;  %s670_s15 = scalar_lea.vmem [#allocation15], %s3956_s30 }
  0x50   : > { %859 = vperm.xlu1 %3209, %v690_v5   ;;  %v3019_v26 = vld [vmem:[#allocation8 + $0x74] sm:$0xf0]  ;;  %v3018_v27 = vld [vmem:[#allocation8 + $0x74] sm:$0xf]  ;;  %v3016_v33 = vld [vmem:[#allocation8 + $0x64] sm:$0xf] }
  0x51   : > { %vm840_vm1 = vcmp.eq.s32.totalorder %v839_v63, 1  ;;  %v2542_v36 = vld [vmem:[#allocation8 + $0x50] sm:$0xf]  ;;  %v3015_v37 = vld [vmem:[#allocation8 + $0x54] sm:$0xf0]  ;;  %s2224_s28 = sshll.u32 %s670_s15, 4  ;;  %s2225_s28 = int_to_ptr.vmem [resolvable:$true] %s2224_s28 }
  0x52   : > { %799 = vmatpush.bf16.msra.mxu0 %v2459_v28  ;;  %v2559_v28 = vor.u32 %v3019_v26, %v2558_v25  ;;  %v3014_v39 = vld [vmem:[#allocation8 + $0x54] sm:$0xf]  ;;  %v3035_v42 = vld [vmem:[#allocation8 + $0xf4] sm:$0xf0]  ;;  %v2624_v44 = vld [vmem:[#allocation8 + $0xf8] sm:$0xf0]  ;;  %v2543_v45 = vor.u32 %v3015_v37, %v2542_v36 }
  0x53   : > { %812 = vmatpush.bf16.msra.mxu1 %v2463_v29  ;;  %v2560_v29 = vld [vmem:[#allocation8 + $0x78] sm:$0xf0]  ;;  %v3034_v43 = vld [vmem:[#allocation8 + $0xf4] sm:$0xf]  ;;  %v3013_v49 = vld [vmem:[#allocation8 + $0x44] sm:$0xf0] }
  0x54   : > { %v2563_v30 = vor.u32 %v3018_v27, %v2560_v29  ;;  %v2606_v60 = vld [vmem:[#allocation8 + $0xd0] sm:$0xf]  ;;  %v3031_v61 = vld [vmem:[#allocation8 + $0xd4] sm:$0xf0]  ;;  %v3030_v62 = vld [vmem:[#allocation8 + $0xd4] sm:$0xf] }
  0x55   : > { %v2607_v5 = vor.u32 %v3031_v61, %v2606_v60  ;;  %v3006_v26 = vld [vmem:[#allocation8 + $0x14] sm:$0xf]  ;;  %v2512_v27 = vld [vmem:[#allocation8 + $0x18] sm:$0xf0]  ;;  %v2510_v29 = vld [vmem:[#allocation8 + $0x10] sm:$0xf] }
  0x56   : > { %800 = vmatpush.bf16.msra.mxu0 %v2451_v34  ;;  %v2551_v34 = vor.u32 %v3017_v32, %v2550_v31  ;;  %v3007_v31 = vld [vmem:[#allocation8 + $0x14] sm:$0xf0]  ;;  %v3026_v37 = vld [vmem:[#allocation8 + $0xb4] sm:$0xf]  ;;  %v2566_v61 = vld [vmem:[#allocation8 + $0x80] sm:$0xf] }
  0x57   : > { %813 = vmatpush.bf16.msra.mxu1 %v2455_v35  ;;  %v2552_v35 = vld [vmem:[#allocation8 + $0x68] sm:$0xf0]  ;;  %s2226_s8 = sshll.u32 %s2222_s19, 4  ;;  %s3469_s14 = scalar_lea.hbm %s4094_s16, 2  ;;  %s2227_s8 = int_to_ptr.hbm [resolvable:$true] %s2226_s8 }
  0x58   : > { %v2555_v38 = vor.u32 %v3016_v33, %v2552_v35  ;;  %v2511_v33 = vor.u32 %v3007_v31, %v2510_v29  ;;  %v3027_v35 = vld [vmem:[#allocation8 + $0xb4] sm:$0xf0]  ;;  %v3000_v29 = vld [vmem:[#allocation11 + $0xe4] sm:$0xf]  ;;  %v2744_v31 = vld [vmem:[#allocation11 + $0xe8] sm:$0xf0] }
  0x59   : > { %s3463_s17 = sshra.s32 %s2227_s8, 4  ;;  %s3464_s17 = int_to_ptr.hbm [resolvable:$true] %s3463_s17 }
  0x5a   : > { %801 = vmatpush.bf16.msra.mxu0 %v2443_v40  ;;  %v2544_v40 = vld [vmem:[#allocation8 + $0x58] sm:$0xf0]  ;;  %s3465_s20 = scalar_lea.hbm %s3464_s17, 1  ;;  %p3470_p3 = scmp.lt.s32.totalorder %s3464_s17, %s4094_s16 }
  0x5b   : > { %814 = vmatpush.bf16.msra.mxu1 %v2447_v41  ;;  %v2622_v41 = vld [vmem:[#allocation8 + $0xf0] sm:$0xf]  ;;  %p3466_p0 = scmp.ne.s32.totalorder %s3464_s17, %s3465_s20  ;;  %p3471_p4 = scmp.lt.s32.totalorder %s3469_s14, %s3465_s20 }
  0x5d   : > { %p3467_p1 = pnand %p3466_p0, %p3697_p5  ;;  %p3472_p7 = por %p3471_p4, %p3470_p3 }
  0x5e   : > { %802 = vmatpush.bf16.msra.mxu0 %v2435_v46  ;;  %v2623_v46 = vor.u32 %v3035_v42, %v2622_v41  ;;  %v3005_v41 = vld [vmem:[#allocation8 + $0x4] sm:$0xf0]  ;;  %v3004_v42 = vld [vmem:[#allocation8 + $0x4] sm:$0xf] }
  0x5f   : > { %815 = vmatpush.bf16.msra.mxu1 %v2439_v47  ;;  %v2627_v47 = vor.u32 %v3034_v43, %v2624_v44  ;;  %v2504_v44 = vld [vmem:[#allocation8 + $0x8] sm:$0xf0]  ;;  %p3468_p2 = pneg %p3467_p1 }
  0x61   : > { %803 = vmatmul.bf16.vlgmr.msra.gmra.mxu0 %v687_v48  ;;  %p3473_p8 = pnand %p3472_p7, %p3468_p2 }
  0x62   : > { %816 = vmatmul.bf16.vlgmr.msra.gmra.mxu1 %v687_v48  ;;  %1210 = vmatpush.bf16.msrb.mxu0 %v2563_v30  ;;  %v2534_v48 = vld [vmem:[#allocation8 + $0x40] sm:$0xf]  ;;  %v2515_v30 = vor.u32 %v3006_v26, %v2512_v27 }
  0x63   : > { %1223 = vmatpush.bf16.msrb.mxu1 %v2627_v47  ;;  %v2582_v47 = vld [vmem:[#allocation8 + $0xa0] sm:$0xf] }
  0x64   : > { %v2742_v27 = vld [vmem:[#allocation11 + $0xe0] sm:$0xf] }
  0x66   : > { %1211 = vmatpush.bf16.msrb.mxu0 %v2555_v38  ;;  %v2592_v38 = vld [vmem:[#allocation8 + $0xb8] sm:$0xf0] }
  0xc2   : > { %v860_v19 = vpop.permute.xlu1 %859 }
  0xde   : > { %v804_v51 = vpop.f32.mrf.mxu0 }
  0xdf   : > { %v817_v53 = vpop.f32.mrf.mxu1  ;;  %v805_v56 = vadd.f32 %v804_v51, %v711_v52  ;;  %v3012_v51 = vld [vmem:[#allocation8 + $0x44] sm:$0xf]  ;;  %v2614_v52 = vld [vmem:[#allocation8 + $0xe0] sm:$0xf] }
  0xe0   : > { %v818_v54 = vadd.f32 %v817_v53, %v712_v50  ;;  %v2547_v50 = vor.u32 %v3014_v39, %v2544_v40  ;;  %v3033_v53 = vld [vmem:[#allocation8 + $0xe4] sm:$0xf0]  ;;  %v2595_v39 = vor.u32 %v3026_v37, %v2592_v38  ;;  %v2502_v40 = vld [vmem:[#allocation8] sm:$0xf]  ;;  %v2688_v37 = vld [vmem:[#allocation11 + $0x78] sm:$0xf0] }
  0xe1   : > { %v821_v58 = vpack.c.bf16 %v805_v56, %v805_v56  ;;  %v3032_v56 = vld [vmem:[#allocation8 + $0xe4] sm:$0xf]  ;;  %v2503_v43 = vor.u32 %v3005_v41, %v2502_v40  ;;  %v2999_v40 = vld [vmem:[#allocation11 + $0xd4] sm:$0xf0]  ;;  %v2998_v41 = vld [vmem:[#allocation11 + $0xd4] sm:$0xf] }
  0xe2   : > { %v822_v55 = vpack.c.bf16 %v818_v54, %v818_v54  ;;  %v2536_v54 = vld [vmem:[#allocation8 + $0x48] sm:$0xf0]  ;;  %1212 = vmatpush.bf16.msrb.mxu0 %v2547_v50 }
  0xe3   : > { %v2539_v63 = vor.u32 %v3012_v51, %v2536_v54  ;;  %v2574_v54 = vld [vmem:[#allocation8 + $0x90] sm:$0xf] }
  0xe4   : > { %830 = vmatpush.bf16.xpose.msra.mxu2 %v822_v55  ;;  %v2615_v55 = vor.u32 %v3033_v53, %v2614_v52  ;;  %v2584_v52 = vld [vmem:[#allocation8 + $0xa8] sm:$0xf0] }
  0xe6   : > { %v806_v57 = vpop.f32.mrf.mxu0  ;;  %1213 = vmatpush.bf16.msrb.mxu0 %v2539_v63  ;;  %v3020_v63 = vld [vmem:[#allocation8 + $0x84] sm:$0xf] }
  0xe7   : > { %v819_v59 = vpop.f32.mrf.mxu1  ;;  %v2616_v57 = vld [vmem:[#allocation8 + $0xe8] sm:$0xf0] }
  0xe8   : > { %v2535_v59 = vor.u32 %v3013_v49, %v2534_v48  ;;  %v3025_v48 = vld [vmem:[#allocation8 + $0xa4] sm:$0xf0]  ;;  %v3024_v49 = vld [vmem:[#allocation8 + $0xa4] sm:$0xf] }
  0xe9   : > { %v2583_v51 = vor.u32 %v3025_v48, %v2582_v47  ;;  %v2587_v53 = vor.u32 %v3024_v49, %v2584_v52  ;;  %v2984_v47 = vld [vmem:[#allocation11 + $0x64] sm:$0xf]  ;;  %v2680_v49 = vld [vmem:[#allocation11 + $0x68] sm:$0xf0]  ;;  %v2997_v52 = vld [vmem:[#allocation11 + $0xc4] sm:$0xf0] }
  0xeb   : > { %831 = vmatmul.bf16.vlgmr.msra.gmra.mxu2 %v821_v58  ;;  %v2619_v58 = vor.u32 %v3032_v56, %v2616_v57  ;;  %v3022_v56 = vld [vmem:[#allocation8 + $0x94] sm:$0xf] }
  0xec   : > { %965 = vmatpush.bf16.msrb.mxu2 %v956_v11 }
  0xed   : > { %1224 = vmatpush.bf16.msrb.mxu1 %v2619_v58  ;;  %v2576_v58 = vld [vmem:[#allocation8 + $0x98] sm:$0xf0] }
  0xf0   : > { %1184 = vmatpush.bf16.msra.mxu2 %v2559_v28  ;;  %v692_v28 = vunpack.c.l.bf16 %v3805_v12 }
  0xf2   : > { %v906_v32 = vsel %vm842_vm2, %v692_v28, 0.0 }
  0xf3   : > { %907 = vadd.xlane.f32.xlu1 %v906_v32  ;;  %v3853_v32 = vor.u32 %v3000_v29, %v2744_v31 }
  0xf4   : > { %1185 = vmatpush.bf16.msra.mxu2 %v2551_v34  ;;  %v2590_v34 = vld [vmem:[#allocation8 + $0xb0] sm:$0xf] }
  0xf5   : > { %v2591_v36 = vor.u32 %v3027_v35, %v2590_v34  ;;  %v2985_v34 = vld [vmem:[#allocation11 + $0x64] sm:$0xf0]  ;;  %v2986_v35 = vld [vmem:[#allocation11 + $0x74] sm:$0xf] }
  0xf6   : > { %v3859_v38 = vor.u32 %v2986_v35, %v2688_v37  ;;  %v2990_v35 = vld [vmem:[#allocation11 + $0x94] sm:$0xf] }
  0xf8   : > { %1186 = vmatpush.bf16.msra.mxu2 %v2543_v45 }
  0xfb   : > { %2498 = vmatmul.msk.bf16.vlgmr.msrb.gmra.mxu2 %vm842_vm2, %v3805_v12 }
  0xfc   : > { %1187 = vmatpush.bf16.msra.mxu2 %v2535_v59  ;;  %v2579_v59 = vor.u32 %v3022_v56, %v2576_v58  ;;  %v2981_v58 = vld [vmem:[#allocation11 + $0x44] sm:$0xf0] }
 0x16e   : > { %v832_v0 = vpop.f32.mrf.mxu2 }
 0x16f   : > { %v836_v1 = vmul.f32 0.1, %v832_v0  ;;  %v2526_v0 = vld [vmem:[#allocation8 + $0x30] sm:$0xf] }
 0x171   : > { %v841_v2 = vsel %vm840_vm1, -1e+09, %v836_v1  ;;  %v3011_v1 = vld [vmem:[#allocation8 + $0x34] sm:$0xf0] }
 0x172   : > { %v843_v3 = vsel %vm842_vm2, %v841_v2, -inf }
 0x173   : > { %844 = vmax.xlane.f32.xlu0 %v843_v3  ;;  %v3010_v3 = vld [vmem:[#allocation8 + $0x34] sm:$0xf] }
 0x176   : > { %v834_v4 = vpop.f32.mrf.mxu2 }
 0x177   : > { %v2528_v4 = vld [vmem:[#allocation8 + $0x38] sm:$0xf0] }
 0x17e   : > { %v967_v45 = vpop.f32.mrf.mxu2 }
 0x17f   : > { %v984_v50 = vpack.c.bf16 %v967_v45, %v967_v45  ;;  %v2670_v45 = vld [vmem:[#allocation11 + $0x50] sm:$0xf] }
 0x186   : > { %v969_v60 = vpop.f32.mrf.mxu2 }
 0x1e6   : > { %v845_v6 = vpop.xlane.xlu0 %844 }
 0x1e7   : > { %v846_v7 = vsub.f32 %v841_v2, %v845_v6  ;;  %v2608_v2 = vld [vmem:[#allocation8 + $0xd8] sm:$0xf0] }
 0x1e8   : > { %v2611_v6 = vor.u32 %v3030_v62, %v2608_v2  ;;  %v3021_v62 = vld [vmem:[#allocation8 + $0x84] sm:$0xf0] }
 0x1e9   : > { %v847_v8 = vmul.f32 1.442695, %v846_v7  ;;  %v2527_v7 = vor.u32 %v3011_v1, %v2526_v0  ;;  %v2567_v0 = vor.u32 %v3021_v62, %v2566_v61  ;;  %v2568_v1 = vld [vmem:[#allocation8 + $0x88] sm:$0xf0]  ;;  %v2672_v61 = vld [vmem:[#allocation11 + $0x58] sm:$0xf0] }
 0x1ea   : > { %1225 = vmatpush.bf16.msrb.mxu1 %v2611_v6  ;;  %v2571_v2 = vor.u32 %v3020_v63, %v2568_v1  ;;  %v2995_v1 = vld [vmem:[#allocation11 + $0xb4] sm:$0xf0] }
 0x1eb   : > { %3212 = vpow2.f32 %v847_v8  ;;  %v2531_v8 = vor.u32 %v3010_v3, %v2528_v4  ;;  %1188 = vmatpush.bf16.msra.mxu2 %v2527_v7 }
 0x1ed   : > { %1214 = vmatpush.bf16.msrb.mxu0 %v2531_v8 }
 0x1f1   : > { %v3213_v9 = vpop.eup %3212 }
 0x1f2   : > { %v849_v10 = vsel %vm842_vm2, %v3213_v9, 0.0 }
 0x1f3   : > { %850 = vadd.xlane.f32.xlu0 %v849_v10  ;;  %v3009_v10 = vld [vmem:[#allocation8 + $0x24] sm:$0xf0] }
 0x266   : > { %v851_v13 = vpop.xlane.xlu0 %850 }
 0x267   : > { %3214 = vrcp.f32 %v851_v13  ;;  %v2520_v13 = vld [vmem:[#allocation8 + $0x28] sm:$0xf0] }
 0x26d   : > { %v3215_v16 = vpop.eup %3214 }
 0x26e   : > { %v853_v17 = vmul.f32 %v3215_v16, %v3213_v9  ;;  %v2518_v9 = vld [vmem:[#allocation8 + $0x20] sm:$0xf] }
 0x26f   : > { %v2519_v16 = vor.u32 %v3009_v10, %v2518_v9 }
 0x270   : > { %v855_v18 = vmul.f32 %v854_v15, %v853_v17 }
 0x271   : > { %1189 = vmatpush.bf16.msra.mxu2 %v2519_v16 }
 0x272   : > { %v856_v20 = vadd.f32 %v855_v18, %v3809_v14  ;;  %v2598_v18 = vld [vmem:[#allocation8 + $0xc0] sm:$0xf] }
 0x274   : > { %v3815_v21 = vmul.f32 %v860_v19, %v856_v20  ;;  %v3029_v19 = vld [vmem:[#allocation8 + $0xc4] sm:$0xf0]  ;;  %v3028_v20 = vld [vmem:[#allocation8 + $0xc4] sm:$0xf] }
 0x275   : > { %1190 = vmatpush.bf16.msra.mxu2 %v2511_v33  ;;  %v2678_v33 = vld [vmem:[#allocation11 + $0x60] sm:$0xf] }
 0x276   : > { %v3819_v22 = vpack.c.bf16 %v3815_v21, %v3815_v21  ;;  %v911_v23 = vsel %vm842_vm2, %v3815_v21, 0.0  ;;  %v894_v10 = vsub.f32 %v3815_v21, %v692_v28  ;;  %v3001_v28 = vld [vmem:[#allocation11 + $0xe4] sm:$0xf0] }
 0x277   : > { %912 = vadd.xlane.f32.xlu2 %v911_v23  ;;  %v2599_v23 = vor.u32 %v3029_v19, %v2598_v18  ;;  %v2750_v18 = vld [vmem:[#allocation11 + $0xf0] sm:$0xf]  ;;  %v3002_v19 = vld [vmem:[#allocation11 + $0xf4] sm:$0xf] }
 0x278   : > { %v865_v24 = vsel %vm842_vm2, %v3819_v22, 0 }
 0x279   : > { %874 = vmatpush.bf16.xpose.msra.mxu3 %v865_v24  ;;  %v2600_v24 = vld [vmem:[#allocation8 + $0xc8] sm:$0xf0]  ;;  %1191 = vmatpush.bf16.msra.mxu2 %v2503_v43  ;;  %v2736_v43 = vld [vmem:[#allocation11 + $0xd8] sm:$0xf0] }
 0x27a   : > { %v2603_v25 = vor.u32 %v3028_v20, %v2600_v24  ;;  %v2686_v24 = vld [vmem:[#allocation11 + $0x70] sm:$0xf] }
 0x27c   : > { %1226 = vmatpush.bf16.msrb.mxu1 %v2603_v25  ;;  %1192 = vmatmul.bf16.vlgmr.msra.gmra.mxu2 %v984_v50  ;;  %v2987_v25 = vld [vmem:[#allocation11 + $0x74] sm:$0xf0] }
 0x27d   : > { %v3846_v21 = vor.u32 %v2987_v25, %v2686_v24  ;;  %v2977_v24 = vld [vmem:[#allocation11 + $0x24] sm:$0xf0] }
 0x27f   : > { %1402 = vmatpush.bf16.msrb.mxu2 %v3846_v21 }
 0x280   : > { %2496 = vmatmul.msk.bf16.vlgmr.msra.gmra.mxu3 %vm842_vm2, %v3819_v22  ;;  %1227 = vmatpush.bf16.msrb.mxu1 %v2595_v39  ;;  %v2734_v39 = vld [vmem:[#allocation11 + $0xd0] sm:$0xf] }
 0x281   : > { %978 = vmatpush.bf16.msrb.mxu3 %v956_v11  ;;  %v3008_v11 = vld [vmem:[#allocation8 + $0x24] sm:$0xf] }
 0x282   : > { %v2523_v17 = vor.u32 %v3008_v11, %v2520_v13  ;;  %v895_v11 = vmul.f32 %v894_v10, %v894_v10  ;;  %v2664_v10 = vld [vmem:[#allocation11 + $0x48] sm:$0xf0] }
 0x284   : > { %1215 = vmatpush.bf16.msrb.mxu0 %v2523_v17  ;;  %1228 = vmatpush.bf16.msrb.mxu1 %v2587_v53  ;;  %v896_v17 = vsel %vm842_vm2, %v895_v11, 0.0  ;;  %v2996_v53 = vld [vmem:[#allocation11 + $0xc4] sm:$0xf] }
 0x285   : > { %1197 = vmatpush.bf16.msra.mxu3 %v2623_v46  ;;  %v2507_v46 = vor.u32 %v3004_v42, %v2504_v44  ;;  %v3862_v42 = vor.u32 %v2999_v40, %v2734_v39  ;;  %v3865_v44 = vor.u32 %v2998_v41, %v2736_v43  ;;  %v2704_v39 = vld [vmem:[#allocation11 + $0x98] sm:$0xf0]  ;;  %v2638_v41 = vld [vmem:[#allocation11 + $0x10] sm:$0xf]  ;;  %v2975_v43 = vld [vmem:[#allocation11 + $0x14] sm:$0xf0] }
 0x286   : > { %v3917_v40 = vor.u32 %v2990_v35, %v2704_v39 }
 0x288   : > { %1216 = vmatpush.bf16.msrb.mxu0 %v2515_v30  ;;  %1229 = vmatpush.bf16.msrb.mxu1 %v2579_v59  ;;  %v3851_v30 = vor.u32 %v3001_v28, %v2742_v27  ;;  %v2982_v59 = vld [vmem:[#allocation11 + $0x54] sm:$0xf]  ;;  %v2656_v28 = vld [vmem:[#allocation11 + $0x38] sm:$0xf0] }
 0x289   : > { %1198 = vmatpush.bf16.msra.mxu3 %v2615_v55  ;;  %v3023_v55 = vld [vmem:[#allocation8 + $0x94] sm:$0xf0]  ;;  %v3885_v63 = vor.u32 %v2982_v59, %v2672_v61  ;;  %v2978_v27 = vld [vmem:[#allocation11 + $0x34] sm:$0xf] }
 0x28a   : > { %v2575_v57 = vor.u32 %v3023_v55, %v2574_v54  ;;  %v2728_v55 = vld [vmem:[#allocation11 + $0xc8] sm:$0xf0]  ;;  %v3911_v31 = vor.u32 %v2978_v27, %v2656_v28 }
 0x28b   : > { %v3877_v56 = vor.u32 %v2996_v53, %v2728_v55  ;;  %v2989_v53 = vld [vmem:[#allocation11 + $0x84] sm:$0xf0]  ;;  %v2988_v55 = vld [vmem:[#allocation11 + $0x84] sm:$0xf] }
 0x28c   : > { %1217 = vmatpush.bf16.msrb.mxu0 %v2507_v46  ;;  %1230 = vmatpush.bf16.msrb.mxu1 %v2571_v2  ;;  %v2983_v46 = vld [vmem:[#allocation11 + $0x54] sm:$0xf0]  ;;  %v2994_v2 = vld [vmem:[#allocation11 + $0xb4] sm:$0xf] }
 0x28d   : > { %1199 = vmatpush.bf16.msra.mxu3 %v2607_v5  ;;  %v3868_v48 = vor.u32 %v2983_v46, %v2670_v45  ;;  %v2976_v45 = vld [vmem:[#allocation11 + $0x24] sm:$0xf]  ;;  %v3920_v46 = vor.u32 %v2975_v43, %v2638_v41 }
 0x28f   : > { %1218 = vmatmul.bf16.vlgmr.msrb.gmra.mxu0 %v984_v50  ;;  %v3871_v50 = vor.u32 %v2984_v47, %v2680_v49  ;;  %v2648_v47 = vld [vmem:[#allocation11 + $0x28] sm:$0xf0]  ;;  %v908_v49 = vpop.xlane.xlu1 %907 }
 0x290   : > { %2499 = vmatmul.msk.bf16.vlgmr.msrb.gmra.mxu3 %vm842_vm2, %v3819_v22  ;;  %1428 = vmatpush.bf16.msra.mxu0 %v3859_v38 }
 0x291   : > { %1200 = vmatpush.bf16.msra.mxu3 %v2599_v23  ;;  %v2752_v23 = vld [vmem:[#allocation11 + $0xf8] sm:$0xf0] }
 0x292   : > { %v3844_v26 = vor.u32 %v3002_v19, %v2752_v23  ;;  %v2646_v23 = vld [vmem:[#allocation11 + $0x20] sm:$0xf] }
 0x293   : > { %v3908_v25 = vor.u32 %v2977_v24, %v2646_v23 }
 0x294   : > { %1441 = vmatpush.bf16.msra.mxu1 %v3844_v26  ;;  %1429 = vmatpush.bf16.msra.mxu0 %v3871_v50 }
 0x295   : > { %1201 = vmatpush.bf16.msra.mxu3 %v2591_v36  ;;  %v3856_v36 = vor.u32 %v2985_v34, %v2678_v33  ;;  %v2702_v33 = vld [vmem:[#allocation11 + $0x90] sm:$0xf]  ;;  %v2991_v34 = vld [vmem:[#allocation11 + $0x94] sm:$0xf0] }
 0x296   : > { %v3914_v37 = vor.u32 %v2991_v34, %v2702_v33  ;;  %v1018_v33 = vld [vmem:[%s4087_s9] sm:$0x3] }
 0x297   : > { %1403 = vmatpush.bf16.msrb.mxu2 %v3856_v36  ;;  %v1021_v43 = vperm.slane %v1018_v33, 1 }
 0x298   : > { %1442 = vmatpush.bf16.msra.mxu1 %v3853_v32  ;;  %1430 = vmatpush.bf16.msra.mxu0 %v3885_v63 }
 0x299   : > { %1202 = vmatpush.bf16.msra.mxu3 %v2583_v51  ;;  %v2726_v51 = vld [vmem:[#allocation11 + $0xc0] sm:$0xf] }
 0x29a   : > { %v3874_v54 = vor.u32 %v2997_v52, %v2726_v51  ;;  %v3923_v51 = vor.u32 %v2976_v45, %v2648_v47  ;;  %v2694_v52 = vld [vmem:[#allocation11 + $0x80] sm:$0xf]  ;;  %v909_v47 = vadd.f32 1.0, %v908_v49 }
 0x29b   : > { %1404 = vmatpush.bf16.msrb.mxu2 %v3868_v48 }
 0x29c   : > { %1443 = vmatpush.bf16.msra.mxu1 %v3865_v44 }
 0x29d   : > { %1203 = vmatpush.bf16.msra.mxu3 %v2575_v57  ;;  %v2662_v57 = vld [vmem:[#allocation11 + $0x40] sm:$0xf] }
 0x29e   : > { %v3880_v60 = vor.u32 %v2981_v58, %v2662_v57  ;;  %v3926_v57 = vor.u32 %v2989_v53, %v2694_v52  ;;  %v2696_v58 = vld [vmem:[#allocation11 + $0x88] sm:$0xf0] }
 0x29f   : > { %v3929_v61 = vor.u32 %v2988_v55, %v2696_v58  ;;  %v1020_v58 = vperm.slane %v1018_v33, 0  ;;  %v2187_v33 = vlaneseq }
 0x2a0   : > { %1444 = vmatpush.bf16.msra.mxu1 %v3877_v56  ;;  %1405 = vmatpush.bf16.msrb.mxu2 %v3880_v60 }
 0x2a1   : > { %1204 = vmatpush.bf16.msra.mxu3 %v2567_v0  ;;  %v2718_v0 = vld [vmem:[#allocation11 + $0xb0] sm:$0xf] }
 0x2ea   : > { %v913_v27 = vpop.xlane.xlu2 %912 }
 0x2eb   : > { %v914_v35 = vadd.f32 1.0, %v913_v27 }
 0x2ed   : > { %3216 = vrcp.f32 %v914_v35 }
 0x2ee   : > { %3218 = vrcp.f32 %v909_v47 }
 0x303   : > { %v876_v3 = vpop.f32.mrf.mxu3 }
 0x304   : > { %v880_v4 = vmul.f32 %v876_v3, %v854_v15  ;;  %v3888_v3 = vor.u32 %v2995_v1, %v2718_v0  ;;  %v2630_v0 = vld [vmem:[#allocation11] sm:$0xf]  ;;  %v2973_v1 = vld [vmem:[#allocation11 + $0x4] sm:$0xf0] }
 0x306   : > { %v881_v5 = vadd.f32 %v880_v4, %v3809_v14  ;;  %v2720_v4 = vld [vmem:[#allocation11 + $0xb8] sm:$0xf0] }
 0x308   : > { %v882_v6 = vsub.f32 %v881_v5, %v3809_v14  ;;  %v3003_v14 = vld [vmem:[#allocation11 + $0xf4] sm:$0xf0]  ;;  %v3891_v5 = vor.u32 %v2994_v2, %v2720_v4  ;;  %v2974_v2 = vld [vmem:[#allocation11 + $0x14] sm:$0xf]  ;;  %v3932_v4 = vor.u32 %v2973_v1, %v2630_v0 }
 0x309   : > { %v3842_v20 = vor.u32 %v3003_v14, %v2750_v18  ;;  %v2712_v18 = vld [vmem:[#allocation11 + $0xa8] sm:$0xf0]  ;;  %v3902_v14 = vpop.f32.mrf.mxu2 }
 0x30a   : > { %v883_v7 = vmul.f32 %v882_v6, %v882_v6  ;;  %v2654_v6 = vld [vmem:[#allocation11 + $0x30] sm:$0xf]  ;;  %1445 = vmatpush.bf16.msra.mxu1 %v3891_v5 }
 0x30b   : > { %v878_v8 = vpop.f32.mrf.mxu3  ;;  %1415 = vmatpush.bf16.msrb.mxu3 %v3842_v20 }
 0x30c   : > { %v884_v9 = vsel %vm842_vm2, %v883_v7, 0.0  ;;  %v3882_v62 = vpop.f32.mrf.mxu0  ;;  %v2979_v7 = vld [vmem:[#allocation11 + $0x34] sm:$0xf0]  ;;  %v2980_v8 = vld [vmem:[#allocation11 + $0x44] sm:$0xf] }
 0x30d   : > { %885 = vadd.xlane.f32.xlu1 %v884_v9  ;;  %v3894_v9 = vor.u32 %v2979_v7, %v2654_v6  ;;  %v3897_v11 = vor.u32 %v2980_v8, %v2664_v10  ;;  %v2640_v6 = vld [vmem:[#allocation11 + $0x18] sm:$0xf0]  ;;  %v2972_v8 = vld [vmem:[#allocation11 + $0x4] sm:$0xf]  ;;  %v2632_v10 = vld [vmem:[#allocation11 + $0x8] sm:$0xf0]  ;;  %v1220_v53 = vadd.f32 %v3882_v62, %v1021_v43 }
 0x30e   : > { %v3935_v7 = vor.u32 %v2974_v2, %v2640_v6  ;;  %v3946_v2 = vpop.eup %3216  ;;  %v1194_v6 = vadd.f32 %v3902_v14, %v1020_v58 }
 0x30f   : > { %1416 = vmatpush.bf16.msrb.mxu3 %v3851_v30  ;;  %1406 = vmatpush.bf16.msrb.mxu2 %v3894_v9 }
 0x310   : > { %1431 = vmatpush.bf16.msra.mxu0 %v3897_v11 }
 0x311   : > { %v1195_v59 = vpop.f32.mrf.mxu2 }
 0x313   : > { %v980_v13 = vpop.f32.mrf.mxu3  ;;  %1417 = vmatpush.bf16.msrb.mxu3 %v3862_v42  ;;  %1407 = vmatpush.bf16.msrb.mxu2 %v3908_v25 }
 0x314   : > { %v985_v16 = vpack.c.bf16 %v980_v13, %v980_v13  ;;  %v2710_v13 = vld [vmem:[#allocation11 + $0xa0] sm:$0xf]  ;;  %v1221_v29 = vpop.f32.mrf.mxu0  ;;  %1432 = vmatpush.bf16.msra.mxu0 %v3911_v31 }
 0x315   : > { %897 = vadd.xlane.f32.xlu1 %v896_v17  ;;  %v2992_v17 = vld [vmem:[#allocation11 + $0xa4] sm:$0xf] }
 0x316   : > { %1205 = vmatmul.bf16.vlgmr.msra.gmra.mxu3 %v985_v16  ;;  %1231 = vmatmul.bf16.vlgmr.msrb.gmra.mxu1 %v985_v16  ;;  %v2993_v16 = vld [vmem:[#allocation11 + $0xa4] sm:$0xf0]  ;;  %v3905_v19 = vor.u32 %v2992_v17, %v2712_v18 }
 0x317   : > { %1418 = vmatpush.bf16.msrb.mxu3 %v3874_v54  ;;  %1408 = vmatpush.bf16.msrb.mxu2 %v3920_v46 }
 0x318   : > { %1446 = vmatpush.bf16.msra.mxu1 %v3905_v19  ;;  %1433 = vmatpush.bf16.msra.mxu0 %v3923_v51 }
 0x31b   : > { %v982_v15 = vpop.f32.mrf.mxu3  ;;  %1419 = vmatpush.bf16.msrb.mxu3 %v3888_v3  ;;  %1409 = vmatpush.bf16.msrb.mxu2 %v3932_v4 }
 0x31c   : > { %v3900_v15 = vor.u32 %v2993_v16, %v2710_v13  ;;  %1447 = vmatpush.bf16.msra.mxu1 %v3917_v40  ;;  %1434 = vmatpush.bf16.msra.mxu0 %v3935_v7  ;;  %v3939_v13 = vor.u32 %v2972_v8, %v2632_v10 }
 0x31f   : > { %1420 = vmatpush.bf16.msrb.mxu3 %v3900_v15 }
 0x320   : > { %1448 = vmatpush.bf16.msra.mxu1 %v3929_v61  ;;  %1435 = vmatpush.bf16.msra.mxu0 %v3939_v13 }
 0x323   : > { %1421 = vmatpush.bf16.msrb.mxu3 %v3914_v37 }
 0x327   : > { %1422 = vmatpush.bf16.msrb.mxu3 %v3926_v57 }
 0x380   : > { %v886_v16 = vpop.xlane.xlu1 %885 }
 0x381   : > { %v887_v17 = vrot.slane %v886_v16, 4 }
 0x383   : > { %v888_v18 = vadd.f32 %v887_v17, %v886_v16  ;;  %v3950_v16 = vpop.eup %3218 }
 0x385   : > { %v889_v23 = vrot.slane %v888_v18, 2 }
 0x387   : > { %v890_v24 = vadd.f32 %v889_v23, %v888_v18 }
 0x388   : > { %v898_v28 = vpop.xlane.xlu1 %897 }
 0x389   : > { %v899_v29 = vrot.slane %v898_v28, 4  ;;  %v891_v34 = vrot.slane %v890_v24, 1 }
 0x38b   : > { %v900_v39 = vadd.f32 %v899_v29, %v898_v28  ;;  %v892_v41 = vadd.f32 %v891_v34, %v890_v24  ;;  %v2188_v34 = vand.u32 127, %v2187_v33 }
 0x38d   : > { %v901_v45 = vrot.slane %v900_v39, 2  ;;  %3084 = vpush %v892_v41  ;;  %vm2190_vm4 = vcmp.eq.s32.totalorder %v2188_v34, 1  ;;  %vm2189_vm5 = vcmp.eq.s32.totalorder %v2188_v34, 0 }
 0x38f   : > { %v902_v52 = vadd.f32 %v901_v45, %v900_v39 }
 0x391   : > { %v903_v55 = vrot.slane %v902_v52, 1 }
 0x393   : > { %v1232_v59 = vpop.f32.mrf.mxu1  ;;  %v904_v0 = vadd.f32 %v903_v55, %v902_v52 }
 0x394   : > { %v1233_v1 = vadd.f32 %v1232_v59, %v1220_v53 }
 0x395   : > { %3086 = vpush %v904_v0 }
 0x396   : > { %v1238_v8 = vmul.f32 %v3946_v2, %v1233_v1 }
 0x398   : > { %v1239_v10 = vmax.f32 %v1238_v8, 0.0 }
 0x399   : > { %v1206_v49 = vpop.f32.mrf.mxu3 }
 0x39a   : > { %v1241_v17 = vpack.c.bf16 %v1239_v10, %v1239_v10  ;;  %v1207_v18 = vadd.f32 %v1206_v49, %v1194_v6  ;;  %v916_v49 = vld [vmem:[#allocation5] sm:$0x1] }
 0x39b   : > { %v1234_v62 = vpop.f32.mrf.mxu1 }
 0x39c   : > { %v1236_v23 = vmul.f32 %v3950_v16, %v1207_v18  ;;  %1423 = vmatmul.bf16.vlgmr.msrb.gmra.mxu3 %v1241_v17  ;;  %1449 = vmatmul.bf16.vlgmr.msra.gmra.mxu1 %v1241_v17  ;;  %v1513_v14 = vsel %vm954_vm3, %v1241_v17, 0 }
 0x39d   : > { %1466 = vmatpush.bf16.xpose.msra.mxu2 %v1241_v17  ;;  %v2497_v17 = vadd.f32 -1.0, %v916_v49 }
 0x39e   : > { %v1237_v24 = vmax.f32 %v1236_v23, 0.0 }
 0x39f   : > { %v918_v18 = vmul.f32 1e+09, %v2497_v17 }
 0x3a0   : > { %v1240_v27 = vpack.c.bf16 %v1237_v24, %v1237_v24 }
 0x3a1   : > { %v1208_v28 = vpop.f32.mrf.mxu3  ;;  %v3961_v62 = vperm.slane %v918_v18, 0  ;;  %v2882_v18 = vld [vmem:[#allocation10 + $0xf0] sm:$0xf] }
 0x3a2   : > { %1410 = vmatmul.bf16.vlgmr.msrb.gmra.mxu2 %v1240_v27  ;;  %1436 = vmatmul.bf16.vlgmr.msra.gmra.mxu0 %v1240_v27  ;;  %v1532_v29 = vsel %vm954_vm3, %v1240_v27, 0 }
 0x3a3   : > { %1479 = vmatpush.bf16.xpose.msra.mxu3 %v1240_v27 }
 0x3a5   : > { %1522 = vmatpush.bf16.msrb.mxu2 %v1513_v14 }
 0x3ab   : > { %1541 = vmatpush.bf16.msrb.mxu3 %v1532_v29 }
 0x3be   : > { %s3085_s18 = spop %3084 }
 0x3bf   : > { %v2193_v39 = vstv %s3085_s18 }
 0x3c6   : > { %s3087_s23 = spop %3086 }
 0x3c7   : > { %v2191_v35 = vstv %s3087_s23 }
 0x3c8   : > { %v2192_v41 = vsel %vm2190_vm4, %v2191_v35, 0.0 }
 0x3c9   : > { %v2194_v43 = vsel %vm2189_vm5, %v2193_v39, %v2192_v41 }
 0x3ca   : > { %2195 = vst [vmem:[%s670_s15] sm:$0x1] %v2194_v43 }
 0x419   : > { %v1450_v45 = vpop.f32.mrf.mxu1 }
 0x41f   : > { %v1424_v47 = vpop.f32.mrf.mxu3  ;;  %v1437_v52 = vpop.f32.mrf.mxu0 }
 0x420   : > { %v1451_v53 = vadd.f32 %v1450_v45, %v1437_v52 }
 0x421   : > { %v1452_v55 = vpop.f32.mrf.mxu1 }
 0x422   : > { %v1455_v58 = vpack.c.bf16 %v1451_v53, %v1451_v53 }
 0x424   : > { %1480 = vmatmul.bf16.vlgmr.msra.gmra.mxu3 %v1455_v58 }
 0x425   : > { %v1411_v59 = vpop.f32.mrf.mxu2 }
 0x426   : > { %v1425_v0 = vadd.f32 %v1424_v47, %v1411_v59 }
 0x427   : > { %v1426_v1 = vpop.f32.mrf.mxu3  ;;  %v1439_v6 = vpop.f32.mrf.mxu0 }
 0x428   : > { %v1454_v8 = vpack.c.bf16 %v1425_v0, %v1425_v0 }
 0x42a   : > { %1467 = vmatmul.bf16.vlgmr.msra.gmra.mxu2 %v1454_v8 }
 0x42d   : > { %v1413_v10 = vpop.f32.mrf.mxu2 }
 0x4a7   : > { %v1481_v23 = vpop.f32.mrf.mxu3 }
 0x4a8   : > { %v1482_v24 = vadd.f32 %v1481_v23, %v3961_v62  ;;  %v3067_v23 = vld [vmem:[#allocation10 + $0xf4] sm:$0xf0] }
 0x4aa   : > { %v1497_v27 = vsel %vm842_vm2, %v1482_v24, -inf }
 0x4ab   : > { %1498 = vmax.xlane.f32.xlu0 %v1497_v27  ;;  %v2874_v27 = vld [vmem:[#allocation10 + $0xe0] sm:$0xf] }
 0x4ad   : > { %v1468_v28 = vpop.f32.mrf.mxu2 }
 0x4ae   : > { %v1469_v14 = vadd.f32 %v1468_v28, %v3961_v62  ;;  %v3065_v28 = vld [vmem:[#allocation10 + $0xe4] sm:$0xf0] }
 0x4af   : > { %v1483_v29 = vpop.f32.mrf.mxu3 }
 0x4b0   : > { %v1485_v33 = vsel %vm842_vm2, %v1469_v14, -inf  ;;  %v2875_v29 = vor.u32 %v3065_v28, %v2874_v27  ;;  %v2884_v27 = vld [vmem:[#allocation10 + $0xf8] sm:$0xf0]  ;;  %v2842_v28 = vld [vmem:[#allocation10 + $0xa0] sm:$0xf] }
 0x4b1   : > { %1486 = vmax.xlane.f32.xlu2 %v1485_v33  ;;  %v3051_v33 = vld [vmem:[#allocation10 + $0x74] sm:$0xf0] }
 0x4b5   : > { %v1470_v34 = vpop.f32.mrf.mxu2 }
 0x51e   : > { %v1499_v35 = vpop.xlane.xlu0 %1498 }
 0x51f   : > { %v1500_v39 = vsub.f32 %v1482_v24, %v1499_v35  ;;  %v2883_v24 = vor.u32 %v3067_v23, %v2882_v18  ;;  %v2866_v35 = vld [vmem:[#allocation10 + $0xd0] sm:$0xf] }
 0x520   : > { %v2786_v23 = vld [vmem:[#allocation10 + $0x30] sm:$0xf] }
 0x521   : > { %v1501_v41 = vmul.f32 1.442695, %v1500_v39  ;;  %1794 = vmatpush.bf16.msrb.mxu1 %v2883_v24  ;;  %v3063_v39 = vld [vmem:[#allocation10 + $0xd4] sm:$0xf0] }
 0x522   : > { %v3043_v24 = vld [vmem:[#allocation10 + $0x34] sm:$0xf0] }
 0x523   : > { %3220 = vpow2.f32 %v1501_v41  ;;  %v2810_v41 = vld [vmem:[#allocation10 + $0x60] sm:$0xf] }
 0x524   : > { %v1487_v43 = vpop.xlane.xlu2 %1486 }
 0x525   : > { %v1488_v45 = vsub.f32 %v1469_v14, %v1487_v43  ;;  %v2818_v14 = vld [vmem:[#allocation10 + $0x70] sm:$0xf]  ;;  %v3049_v43 = vld [vmem:[#allocation10 + $0x64] sm:$0xf0]  ;;  %1795 = vmatpush.bf16.msrb.mxu1 %v2875_v29 }
 0x526   : > { %v2819_v34 = vor.u32 %v3051_v33, %v2818_v14  ;;  %v3057_v14 = vld [vmem:[#allocation10 + $0xa4] sm:$0xf0]  ;;  %v2787_v33 = vor.u32 %v3043_v24, %v2786_v23  ;;  %v3048_v24 = vld [vmem:[#allocation10 + $0x64] sm:$0xf] }
 0x527   : > { %v1489_v47 = vmul.f32 1.442695, %v1488_v45  ;;  %v2811_v45 = vor.u32 %v3049_v43, %v2810_v41  ;;  %v2843_v41 = vor.u32 %v3057_v14, %v2842_v28  ;;  %v2778_v43 = vld [vmem:[#allocation10 + $0x20] sm:$0xf] }
 0x528   : > { %1781 = vmatpush.bf16.msrb.mxu0 %v2819_v34 }
 0x529   : > { %v3221_v52 = vpop.eup %3220  ;;  %3222 = vpow2.f32 %v1489_v47  ;;  %v2867_v47 = vor.u32 %v3063_v39, %v2866_v35  ;;  %v3064_v39 = vld [vmem:[#allocation10 + $0xe4] sm:$0xf] }
 0x52a   : > { %v1503_v53 = vsel %vm842_vm2, %v3221_v52, 0.0 }
 0x52b   : > { %1504 = vadd.xlane.f32.xlu0 %v1503_v53  ;;  %v3061_v53 = vld [vmem:[#allocation10 + $0xc4] sm:$0xf0]  ;;  %1796 = vmatpush.bf16.msrb.mxu1 %v2867_v47  ;;  %v2876_v47 = vld [vmem:[#allocation10 + $0xe8] sm:$0xf0] }
 0x52c   : > { %1782 = vmatpush.bf16.msrb.mxu0 %v2811_v45  ;;  %v3041_v45 = vld [vmem:[#allocation10 + $0x24] sm:$0xf0] }
 0x52f   : > { %v3223_v55 = vpop.eup %3222 }
 0x530   : > { %v1491_v58 = vsel %vm842_vm2, %v3223_v55, 0.0 }
 0x531   : > { %1492 = vadd.xlane.f32.xlu2 %v1491_v58  ;;  %v3047_v58 = vld [vmem:[#allocation10 + $0x54] sm:$0xf0] }
 0x59e   : > { %v1505_v59 = vpop.xlane.xlu0 %1504 }
 0x59f   : > { %3224 = vrcp.f32 %v1505_v59 }
 0x5a4   : > { %v1493_v0 = vpop.xlane.xlu2 %1492 }
 0x5a5   : > { %v3225_v1 = vpop.eup %3224  ;;  %3226 = vrcp.f32 %v1493_v0 }
 0x5a6   : > { %v1507_v6 = vmul.f32 %v3225_v1, %v3221_v52  ;;  %v2858_v52 = vld [vmem:[#allocation10 + $0xc0] sm:$0xf] }
 0x5a7   : > { %v2859_v0 = vor.u32 %v3061_v53, %v2858_v52  ;;  %v2794_v1 = vld [vmem:[#allocation10 + $0x40] sm:$0xf]  ;;  %v2834_v52 = vld [vmem:[#allocation10 + $0x90] sm:$0xf]  ;;  %v3055_v53 = vld [vmem:[#allocation10 + $0x94] sm:$0xf0] }
 0x5a8   : > { %v1508_v8 = vpack.c.bf16 %v1507_v6, %v1507_v6  ;;  %v3045_v6 = vld [vmem:[#allocation10 + $0x44] sm:$0xf0] }
 0x5a9   : > { %1797 = vmatpush.bf16.msrb.mxu1 %v2859_v0  ;;  %v2779_v0 = vor.u32 %v3041_v45, %v2778_v43  ;;  %v3058_v43 = vld [vmem:[#allocation10 + $0xb4] sm:$0xf]  ;;  %v2852_v45 = vld [vmem:[#allocation10 + $0xb8] sm:$0xf0] }
 0x5aa   : > { %2757 = vmatmul.msk.bf16.vlgmr.msrb.gmra.mxu3 %vm842_vm2, %v1508_v8  ;;  %v2850_v8 = vld [vmem:[#allocation10 + $0xb0] sm:$0xf] }
 0x5ab   : > { %v3227_v10 = vpop.eup %3226 }
 0x5ac   : > { %v1495_v49 = vmul.f32 %v3227_v10, %v3223_v55  ;;  %v2802_v55 = vld [vmem:[#allocation10 + $0x50] sm:$0xf]  ;;  %v3059_v10 = vld [vmem:[#allocation10 + $0xb4] sm:$0xf0] }
 0x5ad   : > { %v2803_v59 = vor.u32 %v3047_v58, %v2802_v55  ;;  %v2851_v18 = vor.u32 %v3059_v10, %v2850_v8  ;;  %v3050_v58 = vld [vmem:[#allocation10 + $0x74] sm:$0xf] }
 0x5ae   : > { %v1496_v17 = vpack.c.bf16 %v1495_v49, %v1495_v49  ;;  %v2795_v49 = vor.u32 %v3045_v6, %v2794_v1  ;;  %v2879_v1 = vor.u32 %v3064_v39, %v2876_v47  ;;  %v2835_v6 = vor.u32 %v3055_v53, %v2834_v52  ;;  %v3062_v10 = vld [vmem:[#allocation10 + $0xd4] sm:$0xf]  ;;  %v2804_v39 = vld [vmem:[#allocation10 + $0x58] sm:$0xf0]  ;;  %v3044_v52 = vld [vmem:[#allocation10 + $0x44] sm:$0xf] }
 0x5af   : > { %1783 = vmatpush.bf16.msrb.mxu0 %v2803_v59  ;;  %1798 = vmatpush.bf16.msrb.mxu1 %v2851_v18  ;;  %v2820_v59 = vld [vmem:[#allocation10 + $0x78] sm:$0xf0]  ;;  %v2796_v53 = vld [vmem:[#allocation10 + $0x48] sm:$0xf0] }
 0x5b0   : > { %2756 = vmatmul.msk.bf16.vlgmr.msrb.gmra.mxu2 %vm842_vm2, %v1496_v17  ;;  %v3066_v17 = vld [vmem:[#allocation10 + $0xf4] sm:$0xf]  ;;  %v2823_v18 = vor.u32 %v3050_v58, %v2820_v59  ;;  %v3056_v58 = vld [vmem:[#allocation10 + $0xa4] sm:$0xf]  ;;  %v2844_v59 = vld [vmem:[#allocation10 + $0xa8] sm:$0xf0] }
 0x5b1   : > { %v2887_v35 = vor.u32 %v3066_v17, %v2884_v27  ;;  %v2812_v27 = vld [vmem:[#allocation10 + $0x68] sm:$0xf0] }
 0x5b3   : > { %1784 = vmatpush.bf16.msrb.mxu0 %v2795_v49  ;;  %1799 = vmatpush.bf16.msrb.mxu1 %v2843_v41  ;;  %v2868_v49 = vld [vmem:[#allocation10 + $0xd8] sm:$0xf0] }
 0x5b4   : > { %v2871_v14 = vor.u32 %v3062_v10, %v2868_v49  ;;  %v2836_v10 = vld [vmem:[#allocation10 + $0x98] sm:$0xf0] }
 0x5b7   : > { %1785 = vmatpush.bf16.msrb.mxu0 %v2787_v33  ;;  %1800 = vmatpush.bf16.msrb.mxu1 %v2835_v6  ;;  %v2860_v33 = vld [vmem:[#allocation10 + $0xc8] sm:$0xf0]  ;;  %v2788_v6 = vld [vmem:[#allocation10 + $0x38] sm:$0xf0] }
 0x5bb   : > { %1786 = vmatpush.bf16.msrb.mxu0 %v2779_v0  ;;  %v2799_v0 = vor.u32 %v3044_v52, %v2796_v53  ;;  %v3037_v52 = vld [vmem:[#allocation10 + $0x4] sm:$0xf0]  ;;  %v3036_v53 = vld [vmem:[#allocation10 + $0x4] sm:$0xf] }
 0x62d   : > { %v1543_v29 = vpop.f32.mrf.mxu3 }
 0x62e   : > { %v1548_v34 = vpack.c.bf16 %v1543_v29, %v1543_v29  ;;  %v3060_v29 = vld [vmem:[#allocation10 + $0xc4] sm:$0xf] }
 0x630   : > { %v1566_v55 = vsel %vm954_vm3, %v1548_v34, 0  ;;  %v2815_v34 = vor.u32 %v3048_v24, %v2812_v27  ;;  %v2826_v27 = vld [vmem:[#allocation10 + $0x80] sm:$0xf] }
 0x631   : > { %1575 = vmatpush.bf16.msra.mxu3 %v1566_v55  ;;  %v2855_v55 = vor.u32 %v3058_v43, %v2852_v45  ;;  %v2772_v43 = vld [vmem:[#allocation10 + $0x18] sm:$0xf0] }
 0x633   : > { %v1524_v8 = vpop.f32.mrf.mxu2 }
 0x634   : > { %v1547_v17 = vpack.c.bf16 %v1524_v8, %v1524_v8  ;;  %2759 = vmatmul.msk.bf16.vlgmr.msra.gmra.mxu3 %vm842_vm2, %v3819_v22  ;;  %v2863_v22 = vor.u32 %v3060_v29, %v2860_v33  ;;  %v2847_v8 = vor.u32 %v3056_v58, %v2844_v59  ;;  %v2828_v33 = vld [vmem:[#allocation10 + $0x88] sm:$0xf0] }
 0x635   : > { %1820 = vmatpush.bf16.msrb.mxu3 %v2887_v35  ;;  %v1545_v23 = vpop.f32.mrf.mxu3  ;;  %v3046_v35 = vld [vmem:[#allocation10 + $0x54] sm:$0xf]  ;;  %v2764_v58 = vld [vmem:[#allocation10 + $0x8] sm:$0xf0] }
 0x636   : > { %v1550_v28 = vsel %vm954_vm3, %v1547_v17, 0  ;;  %v2807_v47 = vor.u32 %v3046_v35, %v2804_v39  ;;  %v3040_v17 = vld [vmem:[#allocation10 + $0x24] sm:$0xf]  ;;  %v2770_v35 = vld [vmem:[#allocation10 + $0x10] sm:$0xf]  ;;  %v2767_v59 = vor.u32 %v3036_v53, %v2764_v58 }
 0x637   : > { %1559 = vmatpush.bf16.msra.mxu2 %v1550_v28  ;;  %v3053_v28 = vld [vmem:[#allocation10 + $0x84] sm:$0xf0]  ;;  %v3039_v39 = vld [vmem:[#allocation10 + $0x14] sm:$0xf0] }
 0x638   : > { %v2827_v29 = vor.u32 %v3053_v28, %v2826_v27 }
 0x639   : > { %1821 = vmatpush.bf16.msrb.mxu3 %v2879_v1  ;;  %v3042_v1 = vld [vmem:[#allocation10 + $0x34] sm:$0xf] }
 0x63a   : > { %2758 = vmatmul.msk.bf16.vlgmr.msra.gmra.mxu2 %vm842_vm2, %v3805_v12  ;;  %v3054_v12 = vld [vmem:[#allocation10 + $0x94] sm:$0xf]  ;;  %v2791_v49 = vor.u32 %v3042_v1, %v2788_v6  ;;  %1801 = vmatpush.bf16.msrb.mxu1 %v2827_v29 }
 0x63b   : > { %1807 = vmatpush.bf16.msrb.mxu2 %v2823_v18  ;;  %v1526_v41 = vpop.f32.mrf.mxu2  ;;  %v2780_v18 = vld [vmem:[#allocation10 + $0x28] sm:$0xf0]  ;;  %v2839_v23 = vor.u32 %v3054_v12, %v2836_v10 }
 0x63c   : > { %v2783_v24 = vor.u32 %v3040_v17, %v2780_v18  ;;  %v2771_v41 = vor.u32 %v3039_v39, %v2770_v35 }
 0x63d   : > { %1822 = vmatpush.bf16.msrb.mxu3 %v2871_v14  ;;  %v3052_v14 = vld [vmem:[#allocation10 + $0x84] sm:$0xf] }
 0x63e   : > { %1852 = vmatpush.bf16.msra.mxu1 %v3842_v20  ;;  %1787 = vmatpush.bf16.msrb.mxu0 %v2771_v41 }
 0x63f   : > { %1808 = vmatpush.bf16.msrb.mxu2 %v2815_v34  ;;  %v2831_v34 = vor.u32 %v3052_v14, %v2828_v33 }
 0x641   : > { %1823 = vmatpush.bf16.msrb.mxu3 %v2863_v22  ;;  %v3038_v22 = vld [vmem:[#allocation10 + $0x14] sm:$0xf] }
 0x642   : > { %v2775_v45 = vor.u32 %v3038_v22, %v2772_v43  ;;  %1853 = vmatpush.bf16.msra.mxu1 %v3851_v30 }
 0x643   : > { %1809 = vmatpush.bf16.msrb.mxu2 %v2807_v47  ;;  %v2762_v47 = vld [vmem:[#allocation10] sm:$0xf] }
 0x645   : > { %1824 = vmatpush.bf16.msrb.mxu3 %v2855_v55  ;;  %v2763_v55 = vor.u32 %v3037_v52, %v2762_v47  ;;  %v3238_v52 = vld [vmem:[%s3795_s29] sm:$0xff]  ;;  %s2201_s29 = scalar_lea.sflag [#allocation16], %s3956_s30 }
 0x646   : > { %1854 = vmatpush.bf16.msra.mxu1 %v3862_v42  ;;  %v1615_v42 = vld [vmem:[%s4089_s11] sm:$0x3]  ;;  %v1982_v53 = vsel %vm1981_vm6, %v3238_v52, 0.0 }
 0x647   : > { %1810 = vmatpush.bf16.msrb.mxu2 %v2799_v0  ;;  %1788 = vmatpush.bf16.msrb.mxu0 %v2763_v55  ;;  %v1983_v55 = vrot.slane %v1982_v53, 4 }
 0x649   : > { %1825 = vmatpush.bf16.msrb.mxu3 %v2847_v8  ;;  %v1984_v58 = vadd.f32 %v1983_v55, %v1982_v53 }
 0x64a   : > { %1855 = vmatpush.bf16.msra.mxu1 %v3874_v54 }
 0x64b   : > { %1811 = vmatpush.bf16.msrb.mxu2 %v2791_v49  ;;  %1839 = vmatpush.bf16.msra.mxu0 %v3846_v21 }
 0x64d   : > { %1826 = vmatpush.bf16.msrb.mxu3 %v2839_v23 }
 0x64e   : > { %1856 = vmatpush.bf16.msra.mxu1 %v3888_v3 }
 0x64f   : > { %1812 = vmatpush.bf16.msrb.mxu2 %v2783_v24  ;;  %1840 = vmatpush.bf16.msra.mxu0 %v3856_v36 }
 0x651   : > { %1827 = vmatpush.bf16.msrb.mxu3 %v2831_v34 }
 0x652   : > { %1857 = vmatpush.bf16.msra.mxu1 %v3900_v15 }
 0x653   : > { %1813 = vmatpush.bf16.msrb.mxu2 %v2775_v45  ;;  %1841 = vmatpush.bf16.msra.mxu0 %v3868_v48 }
 0x655   : > { %1878 = vmatpush.bf16.msra.mxu3 %v3844_v26 }
 0x656   : > { %1858 = vmatpush.bf16.msra.mxu1 %v3914_v37 }
 0x657   : > { %1814 = vmatpush.bf16.msrb.mxu2 %v2767_v59  ;;  %1842 = vmatpush.bf16.msra.mxu0 %v3880_v60  ;;  %v1985_v59 = vrot.slane %v1984_v58, 2 }
 0x659   : > { %1879 = vmatpush.bf16.msra.mxu3 %v3853_v32 }
 0x65a   : > { %1859 = vmatpush.bf16.msra.mxu1 %v3926_v57 }
 0x65b   : > { %1865 = vmatpush.bf16.msra.mxu2 %v3859_v38  ;;  %1843 = vmatpush.bf16.msra.mxu0 %v3894_v9 }
 0x65d   : > { %1880 = vmatpush.bf16.msra.mxu3 %v3865_v44  ;;  %v1617_v44 = vperm.slane %v1615_v42, 0 }
 0x65f   : > { %1866 = vmatpush.bf16.msra.mxu2 %v3871_v50  ;;  %1844 = vmatpush.bf16.msra.mxu0 %v3908_v25 }
 0x661   : > { %1881 = vmatpush.bf16.msra.mxu3 %v3877_v56 }
 0x663   : > { %1867 = vmatpush.bf16.msra.mxu2 %v3885_v63  ;;  %1845 = vmatpush.bf16.msra.mxu0 %v3920_v46  ;;  %v1618_v63 = vperm.slane %v1615_v42, 1  ;;  %v3573_v42 = vmov 1  }
 0x664   : > { %3211 = vset.pattern.permute.xlu0 %v3573_v42  ;;  %3210 = vset.pattern.permute.xlu2 %v3573_v42 }
 0x665   : > { %1882 = vmatpush.bf16.msra.mxu3 %v3891_v5 }
 0x667   : > { %1868 = vmatpush.bf16.msra.mxu2 %v3897_v11  ;;  %1846 = vmatpush.bf16.msra.mxu0 %v3932_v4 }
 0x669   : > { %1883 = vmatpush.bf16.msra.mxu3 %v3905_v19 }
 0x66b   : > { %1869 = vmatpush.bf16.msra.mxu2 %v3911_v31 }
 0x66d   : > { %1884 = vmatpush.bf16.msra.mxu3 %v3917_v40 }
 0x66f   : > { %1870 = vmatpush.bf16.msra.mxu2 %v3923_v51 }
 0x671   : > { %1885 = vmatpush.bf16.msra.mxu3 %v3929_v61 }
 0x673   : > { %1871 = vmatpush.bf16.msra.mxu2 %v3935_v7 }
 0x677   : > { %1872 = vmatpush.bf16.msra.mxu2 %v3939_v13 }
 0x6b7   : > { %v1577_v20 = vpop.f32.mrf.mxu3 }
 0x6b8   : > { %v1582_v26 = vpack.c.bf16 %v1577_v20, %v1577_v20  ;;  %v1986_v20 = vadd.f32 %v1985_v59, %v1984_v58 }
 0x6ba   : > { %1802 = vmatmul.bf16.vlgmr.msrb.gmra.mxu1 %v1582_v26  ;;  %1828 = vmatmul.bf16.vlgmr.msrb.gmra.mxu3 %v1582_v26  ;;  %v1987_v26 = vrot.slane %v1986_v20, 1 }
 0x6bd   : > { %v1561_v21 = vpop.f32.mrf.mxu2 }
 0x6be   : > { %v1581_v30 = vpack.c.bf16 %v1561_v21, %v1561_v21  ;;  %v1988_v21 = vadd.f32 %v1987_v26, %v1986_v20 }
 0x6bf   : > { %v1579_v32 = vpop.f32.mrf.mxu3 }
 0x6c0   : > { %1789 = vmatmul.bf16.vlgmr.msrb.gmra.mxu0 %v1581_v30  ;;  %1815 = vmatmul.bf16.vlgmr.msrb.gmra.mxu2 %v1581_v30  ;;  %vm1994_vm7 = vweird.f32 %v1988_v21 }
 0x6c5   : > { %v1563_v36 = vpop.f32.mrf.mxu2 }
 0x6c6   : > { %v3083_v36 = vld [vmem:[#allocation13 + $0x78] sm:$0xff] }
 0x737   : > { %v1803_v38 = vpop.f32.mrf.mxu1 }
 0x73d   : > { %v1790_v48 = vpop.f32.mrf.mxu0  ;;  %v1829_v50 = vpop.f32.mrf.mxu3 }
 0x73e   : > { %v1791_v54 = vadd.f32 %v1790_v48, %v1617_v44  ;;  %v2000_v44 = vand.u32 2147483648, %v1988_v21 }
 0x73f   : > { %v1805_v56 = vpop.f32.mrf.mxu1 }
 0x740   : > { %v1804_v60 = vadd.f32 %v1803_v38, %v1791_v54  ;;  %v3075_v38 = vld [vmem:[#allocation13 + $0x38] sm:$0xff]  ;;  %v3082_v54 = vld [vmem:[#allocation13 + $0x70] sm:$0xff] }
 0x741   : > { %v3074_v56 = vld [vmem:[#allocation13 + $0x30] sm:$0xff] }
 0x742   : > { %v1833_v3 = vmul.f32 %v3950_v16, %v1804_v60 }
 0x743   : > { %v1816_v5 = vpop.f32.mrf.mxu2 }
 0x744   : > { %v1834_v9 = vmax.f32 %v1833_v3, 0.0  ;;  %v1817_v11 = vadd.f32 %v1816_v5, %v1618_v63  ;;  %v2001_v63 = vor.u32 1.1754944e-38, %v2000_v44  ;;  %v3081_v5 = vld [vmem:[#allocation13 + $0x68] sm:$0xff] }
 0x745   : > { %v1831_v15 = vpop.f32.mrf.mxu3  ;;  %v1792_v19 = vpop.f32.mrf.mxu0 }
 0x746   : > { %v1837_v25 = vpack.c.bf16 %v1834_v9, %v1834_v9  ;;  %v1830_v31 = vadd.f32 %v1829_v50, %v1817_v11  ;;  %v1998_v50 = vand.u32 2147483647, %v1988_v21 }
 0x748   : > { %v1835_v37 = vmul.f32 %v3946_v2, %v1830_v31  ;;  %1847 = vmatmul.bf16.vlgmr.msra.gmra.mxu0 %v1837_v25  ;;  %1873 = vmatmul.bf16.vlgmr.msra.gmra.mxu2 %v1837_v25  ;;  %v1966_v40 = vsel %vm954_vm3, %v1837_v25, 0  ;;  %vm1999_vm10 = vcmp.eq.f32.partialorder %v1998_v50, 8.507059e+37 }
 0x749   : > { %1913 = vmatpush.bf16.xpose.msrb.mxu1 %v1837_v25  ;;  %1975 = vmatpush.bf16.msrb.mxu3 %v1966_v40 }
 0x74a   : > { %v1836_v46 = vmax.f32 %v1835_v37, 0.0 }
 0x74b   : > { %v1818_v51 = vpop.f32.mrf.mxu2 }
 0x74c   : > { %v1838_v57 = vpack.c.bf16 %v1836_v46, %v1836_v46 }
 0x74e   : > { %1860 = vmatmul.bf16.vlgmr.msra.gmra.mxu1 %v1838_v57  ;;  %1886 = vmatmul.bf16.vlgmr.msra.gmra.mxu3 %v1838_v57  ;;  %v1947_v61 = vsel %vm954_vm3, %v1838_v57, 0 }
 0x74f   : > { %1900 = vmatpush.bf16.xpose.msrb.mxu0 %v1838_v57  ;;  %1956 = vmatpush.bf16.msrb.mxu2 %v1947_v61  ;;  %v3080_v57 = vld [vmem:[#allocation13 + $0x60] sm:$0xff]  ;;  %v3073_v61 = vld [vmem:[#allocation13 + $0x28] sm:$0xff] }
 0x751   : > { %2173 = vmatpush.bf16.msra.mxu1 %v3083_v36 }
 0x755   : > { %2174 = vmatpush.bf16.msra.mxu1 %v3082_v54 }
 0x757   : > { %2160 = vmatpush.bf16.msra.mxu0 %v3075_v38 }
 0x759   : > { %2175 = vmatpush.bf16.msra.mxu1 %v3081_v5 }
 0x75b   : > { %2161 = vmatpush.bf16.msra.mxu0 %v3074_v56 }
 0x75d   : > { %2176 = vmatpush.bf16.msra.mxu1 %v3080_v57 }
 0x75f   : > { %2162 = vmatpush.bf16.msra.mxu0 %v3073_v61 }
 0x7c5   : > { %v1848_v4 = vpop.f32.mrf.mxu0 }
 0x7cb   : > { %v1861_v7 = vpop.f32.mrf.mxu1  ;;  %v1874_v13 = vpop.f32.mrf.mxu2 }
 0x7cc   : > { %v1862_v16 = vadd.f32 %v1861_v7, %v1848_v4  ;;  %v3079_v4 = vld [vmem:[#allocation13 + $0x58] sm:$0xff]  ;;  %v3072_v7 = vld [vmem:[#allocation13 + $0x20] sm:$0xff] }
 0x7cd   : > { %v1850_v2 = vpop.f32.mrf.mxu0  ;;  %2177 = vmatpush.bf16.msra.mxu1 %v3079_v4  ;;  %2163 = vmatpush.bf16.msra.mxu0 %v3072_v7 }
 0x7ce   : > { %v1891_v0 = vpack.c.bf16 %v1862_v16, %v1862_v16  ;;  %v3071_v16 = vld [vmem:[#allocation13 + $0x18] sm:$0xff]  ;;  %v3077_v2 = vld [vmem:[#allocation13 + $0x48] sm:$0xff] }
 0x7d0   : > { %1901 = vmatmul.bf16.vlgmr.msrb.gmra.mxu0 %v1891_v0  ;;  %v3070_v0 = vld [vmem:[#allocation13 + $0x10] sm:$0xff] }
 0x7d1   : > { %v1887_v1 = vpop.f32.mrf.mxu3  ;;  %2164 = vmatpush.bf16.msra.mxu0 %v3071_v16 }
 0x7d2   : > { %v1888_v6 = vadd.f32 %v1887_v1, %v1874_v13  ;;  %v3078_v13 = vld [vmem:[#allocation13 + $0x50] sm:$0xff]  ;;  %v3076_v1 = vld [vmem:[#allocation13 + $0x40] sm:$0xff] }
 0x7d3   : > { %v1863_v8 = vpop.f32.mrf.mxu1  ;;  %v1876_v12 = vpop.f32.mrf.mxu2  ;;  %2178 = vmatpush.bf16.msra.mxu1 %v3078_v13 }
 0x7d4   : > { %v1892_v10 = vpack.c.bf16 %v1888_v6, %v1888_v6  ;;  %v3069_v6 = vld [vmem:[#allocation13 + $0x8] sm:$0xff]  ;;  %v3068_v8 = vld [vmem:[#allocation13] sm:$0xff] }
 0x7d5   : > { %2165 = vmatpush.bf16.msra.mxu0 %v3070_v0 }
 0x7d6   : > { %1914 = vmatmul.bf16.vlgmr.msrb.gmra.mxu1 %v1892_v10 }
 0x7d7   : > { %2179 = vmatpush.bf16.msra.mxu1 %v3077_v2 }
 0x7d9   : > { %v1889_v49 = vpop.f32.mrf.mxu3  ;;  %2166 = vmatpush.bf16.msra.mxu0 %v3069_v6 }
 0x7db   : > { %2180 = vmatpush.bf16.msra.mxu1 %v3076_v1 }
 0x7dd   : > { %2167 = vmatpush.bf16.msra.mxu0 %v3068_v8 }
 0x84d   : > { %v1902_v17 = vpop.f32.mrf.mxu0 }
 0x84e   : > { %v1903_v18 = vadd.f32 %v1902_v17, %v3961_v62 }
 0x850   : > { %v1919_v23 = vsel %vm842_vm2, %v1903_v18, -inf }
 0x851   : > { %1920 = vmax.xlane.f32.xlu2 %v1919_v23 }
 0x853   : > { %v1915_v24 = vpop.f32.mrf.mxu1 }
 0x854   : > { %v1916_v27 = vadd.f32 %v1915_v24, %v3961_v62 }
 0x855   : > { %v1904_v28 = vpop.f32.mrf.mxu0 }
 0x856   : > { %v1931_v14 = vsel %vm842_vm2, %v1916_v27, -inf }
 0x857   : > { %1932 = vmax.xlane.f32.xlu0 %v1931_v14 }
 0x85b   : > { %v1917_v29 = vpop.f32.mrf.mxu1 }
 0x8c4   : > { %v1921_v33 = vpop.xlane.xlu2 %1920 }
 0x8c5   : > { %v1922_v34 = vsub.f32 %v1903_v18, %v1921_v33 }
 0x8c7   : > { %v1923_v35 = vmul.f32 1.442695, %v1922_v34 }
 0x8c9   : > { %3228 = vpow2.f32 %v1923_v35 }
 0x8ca   : > { %v1933_v39 = vpop.xlane.xlu0 %1932 }
 0x8cb   : > { %v1934_v22 = vsub.f32 %v1916_v27, %v1933_v39 }
 0x8cd   : > { %v1935_v41 = vmul.f32 1.442695, %v1934_v22 }
 0x8cf   : > { %v3229_v43 = vpop.eup %3228  ;;  %3230 = vpow2.f32 %v1935_v41 }
 0x8d0   : > { %v1925_v45 = vsel %vm842_vm2, %v3229_v43, 0.0  ;;  %3232 = vrcp.f32 %v1988_v21 }
 0x8d1   : > { %1926 = vadd.xlane.f32.xlu2 %v1925_v45 }
 0x8d5   : > { %v3231_v47 = vpop.eup %3230 }
 0x8d6   : > { %v1937_v62 = vsel %vm842_vm2, %v3231_v47, 0.0  ;;  %v3233_v30 = vpop.eup %3232 }
 0x8d7   : > { %1938 = vadd.xlane.f32.xlu0 %v1937_v62  ;;  %v1990_v32 = vmul.f32 %v3233_v30, %v1988_v21  ;;  %vm1995_vm8 = vweird.f32 %v3233_v30 }
 0x8d8   : > { %vm1996_vm9 = vmor %vm1994_vm7, %vm1995_vm8 }
 0x8d9   : > { %v1991_v48 = vsub.f32 1.0, %v1990_v32 }
 0x8db   : > { %v1992_v60 = vmul.f32 %v3233_v30, %v1991_v48 }
 0x8dd   : > { %v1993_v3 = vadd.f32 %v3233_v30, %v1992_v60 }
 0x8df   : > { %v1997_v9 = vsel %vm1996_vm9, %v3233_v30, %v1993_v3 }
 0x8e0   : > { %v2002_v11 = vsel %vm1999_vm10, %v2001_v63, %v1997_v9 }
 0x8e9   : > { %2005 = vperm.xlu2 %3210, %v3238_v52  }
 0x8eb   : > { %2017 = vperm.xlu0 %3211, %v2002_v11  }
 0x944   : > { %v1927_v15 = vpop.xlane.xlu2 %1926 }
 0x945   : > { %3234 = vrcp.f32 %v1927_v15 }
 0x94a   : > { %v1939_v19 = vpop.xlane.xlu0 %1938 }
 0x94b   : > { %v3235_v25 = vpop.eup %3234  ;;  %3236 = vrcp.f32 %v1939_v19 }
 0x94c   : > { %v1929_v31 = vmul.f32 %v3235_v25, %v3229_v43  ;;  %v2006_v12 = vpop.permute.xlu2 %2005 }
 0x94e   : > { %v1930_v37 = vpack.c.bf16 %v1929_v31, %v1929_v31 }
 0x950   : > { %2888 = vmatmul.msk.bf16.vlgmr.msrb.gmra.mxu2 %vm842_vm2, %v1930_v37 }
 0x951   : > { %v3237_v40 = vpop.eup %3236 }
 0x952   : > { %v1941_v46 = vmul.f32 %v3237_v40, %v3231_v47 }
 0x954   : > { %v1942_v51 = vpack.c.bf16 %v1941_v46, %v1941_v46 }
 0x956   : > { %2889 = vmatmul.msk.bf16.vlgmr.msrb.gmra.mxu3 %vm842_vm2, %v1942_v51 }
 0x95d   : > { %v2018_v35 = vpop.permute.xlu0 %2017 }
 0x9d3   : > { %v1958_v10 = vpop.f32.mrf.mxu2 }
 0x9d4   : > { %v2021_v49 = vmul.f32 %v2006_v12, %v1958_v10 }
 0x9d6   : > { %v2022_v17 = vrot.slane %v2021_v49, 4 }
 0x9d8   : > { %v2023_v18 = vadd.f32 %v2022_v17, %v2021_v49 }
 0x9d9   : > { %v1977_v23 = vpop.f32.mrf.mxu3 }
 0x9da   : > { %v2024_v24 = vrot.slane %v2023_v18, 2  ;;  %v2008_v27 = vmul.f32 %v2006_v12, %v1977_v23 }
 0x9db   : > { %v1960_v28 = vpop.f32.mrf.mxu2 }
 0x9dc   : > { %v2009_v14 = vrot.slane %v2008_v27, 4  ;;  %v2025_v29 = vadd.f32 %v2024_v24, %v2023_v18 }
 0x9de   : > { %v2010_v33 = vadd.f32 %v2009_v14, %v2008_v27  ;;  %v2026_v34 = vrot.slane %v2025_v29, 1 }
 0x9e0   : > { %v2011_v39 = vrot.slane %v2010_v33, 2  ;;  %v2027_v22 = vadd.f32 %v2026_v34, %v2025_v29 }
 0x9e1   : > { %v1979_v41 = vpop.f32.mrf.mxu3 }
 0x9e2   : > { %v2012_v43 = vadd.f32 %v2011_v39, %v2010_v33  ;;  %v2028_v45 = vmul.f32 %v2027_v22, %v2018_v35 }
 0x9e4   : > { %v2013_v47 = vrot.slane %v2012_v43, 1  ;;  %v2030_v62 = vpack.c.bf16 %v2028_v45, %v2028_v45 }
 0x9e6   : > { %v2014_v52 = vadd.f32 %v2013_v47, %v2012_v43  ;;  %2181 = vmatmul.bf16.vlgmr.msra.gmra.mxu1 %v2030_v62 }
 0x9e8   : > { %v2020_v53 = vmul.f32 %v2018_v35, %v2014_v52 }
 0x9ea   : > { %v2029_v55 = vpack.c.bf16 %v2020_v53, %v2020_v53 }
 0x9ec   : > { %2168 = vmatmul.bf16.vlgmr.msra.gmra.mxu0 %v2029_v55 }
 0x9ed   : > { %3476 = shalt.err (!%p3473_p8)
}
 0x9ee   : > { %3117 = dma.vmem_to_hbm [thread:$0]  (%p3697_p5), %s2225_s28, 16, %s2227_s8, %s2201_s29  }
 0x9ef   : > { %s4122_s21 = sld [smem:[#allocation34_spill]]  ;;  %s664_s17 = scalar_lea.vmem [#allocation14], %s3956_s30 }
 0x9f0   : > { %s4124_s12 = sld [smem:[#allocation33_spill]]  ;;  %s2211_s20 = sshll.u32 %s664_s17, 4  ;;  %s2212_s20 = int_to_ptr.vmem [resolvable:$true] %s2211_s20 }
 0x9f1   : > { %s2197_s28 = scalar_lea.sflag [#allocation4], %s3956_s30 }
 0x9f5   : > { %s4123_s26 = smov %s4122_s21  ;;  %s2209_s5 = scalar_lea.hbm %s4122_s21, %s3680_s25 }
 0x9f6   : > { %v2063_v59 = vld [vmem:[%s4124_s12] sm:$0x1]  ;;  %s2213_s14 = sshll.u32 %s2209_s5, 4  ;;  %s3497_s23 = scalar_lea.hbm %s4123_s26, 2  ;;  %s2214_s14 = int_to_ptr.hbm [resolvable:$true] %s2213_s14 }
 0x9f7   : > { %s3491_s8 = sshra.s32 %s2214_s14, 4  ;;  %s3492_s8 = int_to_ptr.hbm [resolvable:$true] %s3491_s8 }
 0x9f8   : > { %s3493_s29 = scalar_lea.hbm %s3492_s8, 1  ;;  %p3498_p12 = scmp.lt.s32.totalorder %s3492_s8, %s4123_s26 }
 0x9f9   : > { %p3494_p9 = scmp.ne.s32.totalorder %s3492_s8, %s3493_s29  ;;  %p3499_p13 = scmp.lt.s32.totalorder %s3497_s23, %s3493_s29 }
 0x9fb   : > { %p3495_p10 = pnand %p3494_p9, %p3697_p5  ;;  %p3500_p0 = por %p3499_p13, %p3498_p12 }
 0x9fd   : > { %p3496_p11 = pneg %p3495_p10 }
 0x9ff   : > { %p3501_p1 = pnand %p3500_p0, %p3496_p11 }
 0xa63   : > { %v2182_v58 = vpop.f32.mrf.mxu1 }
 0xa69   : > { %v2169_v20 = vpop.f32.mrf.mxu0 }
 0xa6a   : > { %v2170_v26 = vadd.f32 %v2169_v20, %v2063_v59 }
 0xa6b   : > { %v2184_v21 = vpop.f32.mrf.mxu1 }
 0xa6c   : > { %v2183_v30 = vadd.f32 %v2182_v58, %v2170_v26 }
 0xa6e   : > { %2186 = vst [vmem:[%s664_s17] sm:$0x1] %v2183_v30 }
 0xa6f   : > { %3504 = shalt.err (!%p3501_p1)
}
 0xa70   : > { %3116 = dma.vmem_to_hbm [thread:$0]  (%p3697_p5), %s2212_s20, 16, %s2214_s14, %s2197_s28  }
 0xa71   : > { %v2171_v32 = vpop.f32.mrf.mxu0 }
 0xa72 PF: > { %s4125_s30 = sld [smem:[#allocation25_spill]] }
 0xa73   : > { %s4126_s21 = sld [smem:[#allocation23_spill]] }
 0xa78   : > { %p3163_p2 = scmp.ge.s32.totalorder %s4125_s30, 2 }
 0xa79   : > { %s2238_s19 = sand.u32 1, %s4126_s21  }
 0xa7a   : > { %p3143_p3 = pnand %p3163_p2, %p3701_p6  ;;  %s2239_s24 = scalar_lea.sflag [#allocation4], %s2238_s19 }
 0xa7c   : > { %p3144_p4 = pneg %p3143_p3 }
 0xa7e   : > { %3538 = dma.done.wait (%p3144_p4), %s2239_s24, 16  }
 0xa7f   : > { %3540 = vsyncadd (%p3144_p4), %s2239_s24, 4294967280  ;;  %s2248_s12 = scalar_lea.sflag [#allocation16], %s2238_s19 }
 0xa80   : > { %3542 = dma.done.wait (%p3144_p4), %s2248_s12, 16  }
 0xa81   : > { %3544 = vsyncadd (%p3144_p4), %s2248_s12, 4294967280  ;;  %s4128_s24 = sld [smem:[#allocation26_spill]]  ;;  %s4131_s21 = smov %s3551_s22 }
 0xa82   : > { %s4129_s0 = sld [smem:[#allocation24_spill]] }
 0xa83   : > { %s4130_s23 = sld [smem:[#allocation27_spill]] }
 0xa87   : > { %p34_p5 = scmp.ge.s32.totalorder %s4128_s24, 4  }
 0xa88   : > { %s4132_s22 = smov %s4129_s0 }
 0xa89   :  { %36 = sbr.rel (!%p34_p5) target bundleno = 16 (0x10), region = 170 }
 0xa8e   :  { %2253 = vsyncpa [#allocation3], 1 }
 0xa8f   :  { %2255 = vsyncpa [#allocation3 + $0x1], 1 }
 0xa90   :  { %2256 = vsyncpa [#allocation6], 1 }
 0xa91   :  { %2257 = vsyncpa [#allocation9], 1 }
 0xa92   :  { %2258 = vsyncpa [#allocation12], 1 }
 0xa93   :  { %2259 = vsyncpa [#allocation4], 1 }
 0xa94   :  { %2261 = vsyncpa [#allocation4 + $0x1], 1 }
 0xa95   :  { %2262 = vsyncpa [#allocation16], 1 }
 0xa96   :  { %2264 = vsyncpa [#allocation16 + $0x1], 1 }

</bundles_post_ra>
